<compile_context>
chip_gen: v7x
topology: tpu7x:2x2x1
jax: 0.10.0
libtpu: 0.0.40
codegen_flags: <defaults>
</compile_context>

<pallas_src>
import functools

import jax
import jax.numpy as jnp
from jax.experimental import pallas as pl
from jax.experimental.pallas import tpu as pltpu

EPS = 1e-5                    # PyTorch LayerNorm default eps
MXU_DTYPE = jnp.bfloat16      # matmul operand dtype (f32 accumulation);
                              # set to jnp.float32 for exact fp32 parity.

# Row indices of the packed per-layer fp32 vector slab (L, 8, D).
_LN1_W, _LN1_B, _LN2_W, _LN2_B, _OUT_B, _FC2_B, _FC1_B, _PAD = range(8)


def _layernorm(x, w, b):
    """LayerNorm over the last axis in fp32 with one-pass statistics."""
    xf = x.astype(jnp.float32)
    mean = jnp.mean(xf, axis=-1, keepdims=True)
    mean_sq = jnp.mean(xf * xf, axis=-1, keepdims=True)
    var = mean_sq - mean * mean
    return (xf - mean) * jax.lax.rsqrt(var + EPS) * w + b


def faformer_kernel(n_head, B, S, D, n_layers,
                    seq0_ref, vec_ref, in_b_ref, in_w_ref, wout_ref,
                    fc1_w_ref, fc2_w_ref, head_vec_ref, fc_w_ref,
                    o_ref, seq_scr):
    """Whole FAFormer stack + ln_post + fc head in one kernel invocation."""
    H = n_head
    Dh = D // H
    M = B * S
    Dr = fc1_w_ref.shape[2]
    out_dim = fc_w_ref.shape[0]
    scale = 1.0 / float(Dh) ** 0.5

    x = seq0_ref[...].astype(jnp.float32)                          # (M, D) f32

    for l in range(n_layers):                                      # unrolled (L is small)
        vec = vec_ref[l]                                           # (8, D) f32, one load

        # ---------------- attention branch ----------------
        h = _layernorm(x, vec[_LN1_W], vec[_LN1_B])                # (M, D) f32
        qkv = jnp.dot(h.astype(MXU_DTYPE), in_w_ref[l],
                      preferred_element_type=jnp.float32) + in_b_ref[l]   # (M, 3D) f32

        # Single head-split relayout: (M,3D) -> (B,S,3H,Dh) -> (B,3H,S,Dh).
        r = jnp.transpose(qkv.astype(MXU_DTYPE).reshape(B, S, 3 * H, Dh),
                          (0, 2, 1, 3))
        q = r[:, 0 * H:1 * H].reshape(B * H, S, Dh)
        k = r[:, 1 * H:2 * H].reshape(B * H, S, Dh)
        v = r[:, 2 * H:3 * H].reshape(B * H, S, Dh)

        # TODO(synk): at toy S=8 / Dh=16 these batched matmuls are MXU-lane
        # sparse; production shapes would tile >=128-row query blocks.
        sc = jnp.einsum('nqd,nkd->nqk', q, k,
                        preferred_element_type=jnp.float32) * scale        # (BH,S,S)
        sc = sc - jnp.max(sc, axis=-1, keepdims=True)
        p = jnp.exp(sc)
        p = p * pl.reciprocal(jnp.sum(p, axis=-1, keepdims=True), approx=True)
        ctx = jnp.einsum('nqk,nkd->nqd', p.astype(MXU_DTYPE), v,
                         preferred_element_type=jnp.float32)               # (BH,S,Dh)

        # Head merge folded into out_proj: batched per-head (S,Dh)@(Dh,D),
        # then a cheap outer-axis sum over heads (no transpose back).
        per_head = jnp.einsum('nsd,ndo->nso', ctx.astype(MXU_DTYPE), wout_ref[l],
                              preferred_element_type=jnp.float32)          # (BH,S,D)
        attn = per_head.reshape(B, H, S, D).sum(axis=1).reshape(M, D) + vec[_OUT_B]

        x = x + attn

        # ---------------- MLP branch ----------------
        h2 = _layernorm(x, vec[_LN2_W], vec[_LN2_B])
        m = jnp.dot(h2.astype(MXU_DTYPE), fc1_w_ref[l],
                    preferred_element_type=jnp.float32) + vec[_FC1_B][:Dr]
        m = jnp.maximum(m, 0.0)                                    # ReLU; Dropout -> id
        m = jnp.dot(m.astype(MXU_DTYPE), fc2_w_ref[l],
                    preferred_element_type=jnp.float32) + vec[_FC2_B]      # Dropout -> id
        x = x + m

    # ---------------- head: ln_post + fc on the CLS token ----------------
    seq_scr[...] = x
    cls = seq_scr[pl.ds(0, B, stride=S), :]                        # rows 0, S, 2S, ... -> (B, D)
    hv = head_vec_ref[...]                                         # (3, D) f32
    y = _layernorm(cls, hv[0], hv[1])                              # (B, D)
    # out_dim is tiny (1): VPU mul + lane-reduce instead of a 1-lane MXU matmul.
    # TODO(synk): for large out_dim switch this back to an MXU matmul.
    out = jnp.sum(y[:, None, :] * fc_w_ref[...][None, :, :], axis=-1)      # (B, out_dim)
    out = out + hv[2][:out_dim]                                    # Dropout -> id
    o_ref[...] = out.astype(o_ref.dtype)


def init_params(key, D, red, layers, out_dim):
    """Parameters in PyTorch layout: Linear weights are (out_features, in_features)."""
    Dr = D // red
    layer_params = []
    for _ in range(layers):
        key, k1, k2, k3, k4 = jax.random.split(key, 5)
        layer_params.append(dict(
            ln1_w=jnp.ones((D,), jnp.float32),
            ln1_b=jnp.zeros((D,), jnp.float32),
            in_w=(jax.random.normal(k1, (3 * D, D)) * 0.02).astype(jnp.float32),
            in_b=jnp.zeros((3 * D,), jnp.float32),
            out_w=(jax.random.normal(k2, (D, D)) * 0.01).astype(jnp.float32),
            out_b=jnp.zeros((D,), jnp.float32),
            ln2_w=jnp.ones((D,), jnp.float32),
            ln2_b=jnp.zeros((D,), jnp.float32),
            fc1_w=(jax.random.normal(k3, (Dr, D)) * 0.01).astype(jnp.float32),
            fc1_b=jnp.zeros((Dr,), jnp.float32),
            fc2_w=(jax.random.normal(k4, (D, Dr)) * 0.01).astype(jnp.float32),
            fc2_b=jnp.zeros((D,), jnp.float32),
        ))
    key, kc, kf = jax.random.split(key, 3)
    misc = dict(
        cls_token=(jax.random.normal(kc, (D,)) * 0.02).astype(jnp.float32),
        ln_post_w=jnp.ones((D,), jnp.float32),
        ln_post_b=jnp.zeros((D,), jnp.float32),
        fc_w=(jax.random.normal(kf, (out_dim, D)) * 0.01).astype(jnp.float32),
        fc_b=jnp.zeros((out_dim,), jnp.float32),
    )
    return layer_params, misc


def net_stage2_forward(x, cls_tokens, layer_params, misc, n_head):
    """x: (B,C,H,W) image (consumed by the backbone stand-in outside);
    cls_tokens: (B, N, D) per-stage backbone tokens."""
    del x
    B, N, D = cls_tokens.shape
    S = N + 1
    M = B * S
    L = len(layer_params)
    H = n_head
    Dh = D // H
    out_dim = misc['fc_w'].shape[0]

    # cls token + backbone tokens, flattened to a sublane/lane-dense (B*S, D) slab.
    cls = jnp.broadcast_to(misc['cls_token'].reshape(1, 1, D), (B, 1, D))
    seq0 = jnp.concatenate([cls, cls_tokens], axis=1).reshape(M, D)

    def stack(name):
        return jnp.stack([lp[name] for lp in layer_params], axis=0)

    def padded_row(name):
        a = stack(name)                                            # (L, w)
        w = a.shape[1]
        return a if w == D else jnp.pad(a, ((0, 0), (0, D - w)))

    # Packed per-layer fp32 vector slab: one ref instead of seven tiny ones.
    vec_slab = jnp.stack([padded_row('ln1_w'), padded_row('ln1_b'),
                          padded_row('ln2_w'), padded_row('ln2_b'),
                          padded_row('out_b'), padded_row('fc2_b'),
                          padded_row('fc1_b'),
                          jnp.zeros((L, D), jnp.float32)], axis=1)          # (L, 8, D)

    in_b = stack('in_b')                                                     # (L, 3D) f32

    # Linear weights pre-transposed to (in, out) and cast to bf16 on the host.
    in_w = jnp.stack([lp['in_w'].T for lp in layer_params]).astype(MXU_DTYPE)    # (L, D, 3D)
    fc1_w = jnp.stack([lp['fc1_w'].T for lp in layer_params]).astype(MXU_DTYPE)  # (L, D, Dr)
    fc2_w = jnp.stack([lp['fc2_w'].T for lp in layer_params]).astype(MXU_DTYPE)  # (L, Dr, D)

    # Out-projection in per-head form (head merge folded into the matmul):
    # (L, B*H, Dh, D), replicated over B so the kernel batches over n = b*H + h.
    def out_w_heads(lp):
        w_t = lp['out_w'].T.reshape(H, Dh, D)                                # (H, Dh, D)
        return jnp.broadcast_to(w_t[None], (B, H, Dh, D)).reshape(B * H, Dh, D)
    wout = jnp.stack([out_w_heads(lp) for lp in layer_params]).astype(MXU_DTYPE)

    # Head params: ln_post weight/bias + fc bias packed into one (3, D) slab.
    fc_b_pad = jnp.pad(misc['fc_b'], (0, D - out_dim)) if out_dim < D else misc['fc_b']
    head_vec = jnp.stack([misc['ln_post_w'], misc['ln_post_b'], fc_b_pad])   # (3, D)
    fc_w = misc['fc_w']                                                      # (out_dim, D) f32

    kernel = functools.partial(faformer_kernel, n_head, B, S, D, L)
    vmem_spec = pl.BlockSpec(memory_space=pltpu.MemorySpace.VMEM)            # whole array in VMEM

    return pl.pallas_call(
        kernel,
        out_shape=jax.ShapeDtypeStruct((B, out_dim), jnp.float32),
        in_specs=[vmem_spec] * 9,
        out_specs=vmem_spec,
        scratch_shapes=[pltpu.VMEM((M, D), jnp.float32)],
        compiler_params=pltpu.CompilerParams(vmem_limit_bytes=32 * 1024 * 1024),
    )(seq0, vec_slab, in_b, in_w, wout, fc1_w, fc2_w, head_vec, fc_w)


if __name__ == "__main__":
    # Small shapes consistent with the module.
    B, C, H, W = 2, 4, 16, 16
    D, HEADS, LAYERS, RED, N_TOK, OUT_DIM = 64, 4, 2, 2, 7, 1

    key = jax.random.PRNGKey(0)
    key, kx, kb, kp = jax.random.split(key, 4)

    x = jax.random.normal(kx, (B, C, H, W), jnp.float32)

    # TODO(synk): net_stage1 backbone source is not provided; use a deterministic
    # stand-in token extractor (global average pool + fixed projection) in plain JAX.
    pooled = jnp.mean(x, axis=(2, 3))                              # (B, C)
    proj = (jax.random.normal(kb, (C, N_TOK * D)) * 0.1).astype(jnp.float32)
    cls_tokens = (pooled @ proj).reshape(B, N_TOK, D)              # (B, N, D)

    layer_params, misc = init_params(kp, D, RED, LAYERS, OUT_DIM)

    fwd = jax.jit(functools.partial(net_stage2_forward, n_head=HEADS))
    result = fwd(x, cls_tokens, layer_params, misc)
    jax.block_until_ready(result)
    assert result.shape == (B, OUT_DIM)
    print("KERNEL_OK")
</pallas_src>

<mosaic_0001>
module attributes {stable_mosaic.version = 11 : i64} {
  func.func @faformer_kernel(%arg0: memref<16x64xf32, #tpu.memory_space<vmem>>, %arg1: memref<2x8x64xf32, #tpu.memory_space<vmem>>, %arg2: memref<2x192xf32, #tpu.memory_space<vmem>>, %arg3: memref<2x64x192xbf16, #tpu.memory_space<vmem>>, %arg4: memref<2x8x16x64xbf16, #tpu.memory_space<vmem>>, %arg5: memref<2x64x32xbf16, #tpu.memory_space<vmem>>, %arg6: memref<2x32x64xbf16, #tpu.memory_space<vmem>>, %arg7: memref<3x64xf32, #tpu.memory_space<vmem>>, %arg8: memref<1x64xf32, #tpu.memory_space<vmem>>, %arg9: memref<2x1xf32, #tpu.memory_space<vmem>>, %arg10: memref<16x64xf32, #tpu.memory_space<vmem>>) attributes {dimension_semantics = [], scalar_prefetch = 0 : i64, scratch_operands = 1 : i64, tpu.core_type = #tpu.core_type<tc>} {
    %c0 = arith.constant 0 : index
    %c0_0 = arith.constant 0 : index
    %0 = vector.load %arg0[%c0, %c0_0] : memref<16x64xf32, #tpu.memory_space<vmem>>, vector<16x64xf32>
    %c0_1 = arith.constant 0 : index
    %c0_2 = arith.constant 0 : index
    %c0_3 = arith.constant 0 : index
    %1 = vector.load %arg1[%c0_1, %c0_2, %c0_3] : memref<2x8x64xf32, #tpu.memory_space<vmem>>, vector<1x8x64xf32>
    %2 = vector.shape_cast %1 : vector<1x8x64xf32> to vector<8x64xf32>
    %3 = vector.extract_strided_slice %2 {offsets = [0, 0], sizes = [1, 64], strides = [1, 1]} : vector<8x64xf32> to vector<1x64xf32>
    %4 = vector.shape_cast %3 : vector<1x64xf32> to vector<64xf32>
    %5 = vector.extract_strided_slice %2 {offsets = [1, 0], sizes = [1, 64], strides = [1, 1]} : vector<8x64xf32> to vector<1x64xf32>
    %6 = vector.shape_cast %5 : vector<1x64xf32> to vector<64xf32>
    %cst = arith.constant dense<0.000000e+00> : vector<16xf32>
    %7 = vector.multi_reduction <add>, %0, %cst [1] : vector<16x64xf32> to vector<16xf32>
    %8 = vector.shape_cast %7 : vector<16xf32> to vector<16x1xf32>
    %cst_4 = arith.constant 6.400000e+01 : f32
    %9 = vector.broadcast %cst_4 : f32 to vector<16x1xf32>
    %10 = arith.divf %8, %9 : vector<16x1xf32>
    %11 = arith.mulf %0, %0 : vector<16x64xf32>
    %cst_5 = arith.constant dense<0.000000e+00> : vector<16xf32>
    %12 = vector.multi_reduction <add>, %11, %cst_5 [1] : vector<16x64xf32> to vector<16xf32>
    %13 = vector.shape_cast %12 : vector<16xf32> to vector<16x1xf32>
    %cst_6 = arith.constant 6.400000e+01 : f32
    %14 = vector.broadcast %cst_6 : f32 to vector<16x1xf32>
    %15 = arith.divf %13, %14 : vector<16x1xf32>
    %16 = arith.mulf %10, %10 : vector<16x1xf32>
    %17 = arith.subf %15, %16 : vector<16x1xf32>
    %18 = vector.broadcast %10 : vector<16x1xf32> to vector<16x64xf32>
    %19 = arith.subf %0, %18 : vector<16x64xf32>
    %cst_7 = arith.constant 9.99999974E-6 : f32
    %20 = vector.broadcast %cst_7 : f32 to vector<16x1xf32>
    %21 = arith.addf %17, %20 : vector<16x1xf32>
    %22 = math.rsqrt %21 : vector<16x1xf32>
    %23 = vector.broadcast %22 : vector<16x1xf32> to vector<16x64xf32>
    %24 = arith.mulf %19, %23 : vector<16x64xf32>
    %25 = vector.shape_cast %4 : vector<64xf32> to vector<1x64xf32>
    %26 = vector.broadcast %25 : vector<1x64xf32> to vector<16x64xf32>
    %27 = arith.mulf %24, %26 : vector<16x64xf32>
    %28 = vector.shape_cast %6 : vector<64xf32> to vector<1x64xf32>
    %29 = vector.broadcast %28 : vector<1x64xf32> to vector<16x64xf32>
    %30 = arith.addf %27, %29 : vector<16x64xf32>
    %31 = arith.truncf %30 : vector<16x64xf32> to vector<16x64xbf16>
    %c0_8 = arith.constant 0 : index
    %c0_9 = arith.constant 0 : index
    %c0_10 = arith.constant 0 : index
    %32 = vector.load %arg3[%c0_8, %c0_9, %c0_10] : memref<2x64x192xbf16, #tpu.memory_space<vmem>>, vector<1x64x192xbf16>
    %33 = vector.shape_cast %32 : vector<1x64x192xbf16> to vector<64x192xbf16>
    %cst_11 = arith.constant dense<0.000000e+00> : vector<16x192xf32>
    %34 = tpu.matmul %31, %33, %cst_11 {dimension_numbers = #tpu.dot_dimension_numbers<[1], [0], [0], [1], [0, 0, 1, 1], [], []>} : vector<16x64xbf16>, vector<64x192xbf16>, vector<16x192xf32> -> vector<16x192xf32>
    %c0_12 = arith.constant 0 : index
    %c0_13 = arith.constant 0 : index
    %35 = vector.load %arg2[%c0_12, %c0_13] : memref<2x192xf32, #tpu.memory_space<vmem>>, vector<1x192xf32>
    %36 = vector.shape_cast %35 : vector<1x192xf32> to vector<192xf32>
    %37 = vector.shape_cast %36 : vector<192xf32> to vector<1x192xf32>
    %38 = vector.broadcast %37 : vector<1x192xf32> to vector<16x192xf32>
    %39 = arith.addf %34, %38 : vector<16x192xf32>
    %40 = arith.truncf %39 : vector<16x192xf32> to vector<16x192xbf16>
    %41 = vector.shape_cast %40 : vector<16x192xbf16> to vector<2x8x12x16xbf16>
    %42 = tpu.transpose %41, [0, 2, 1, 3] : vector<2x8x12x16xbf16> -> vector<2x12x8x16xbf16>
    %43 = vector.extract_strided_slice %42 {offsets = [0, 0, 0, 0], sizes = [2, 4, 8, 16], strides = [1, 1, 1, 1]} : vector<2x12x8x16xbf16> to vector<2x4x8x16xbf16>
    %44 = vector.shape_cast %43 : vector<2x4x8x16xbf16> to vector<8x8x16xbf16>
    %45 = vector.extract_strided_slice %42 {offsets = [0, 4, 0, 0], sizes = [2, 4, 8, 16], strides = [1, 1, 1, 1]} : vector<2x12x8x16xbf16> to vector<2x4x8x16xbf16>
    %46 = vector.shape_cast %45 : vector<2x4x8x16xbf16> to vector<8x8x16xbf16>
    %47 = vector.extract_strided_slice %42 {offsets = [0, 8, 0, 0], sizes = [2, 4, 8, 16], strides = [1, 1, 1, 1]} : vector<2x12x8x16xbf16> to vector<2x4x8x16xbf16>
    %48 = vector.shape_cast %47 : vector<2x4x8x16xbf16> to vector<8x8x16xbf16>
    "tpu.trace_start"() <{level = 10 : i32, message = "nqd,nkd->nqk"}> : () -> ()
    %cst_14 = arith.constant dense<0.000000e+00> : vector<8x8x8xf32>
    %49 = tpu.matmul %44, %46, %cst_14 {dimension_numbers = #tpu.dot_dimension_numbers<[2], [2], [1], [1], [0, 0, 0, 1, 1, 1], [0], [0]>} : vector<8x8x16xbf16>, vector<8x8x16xbf16>, vector<8x8x8xf32> -> vector<8x8x8xf32>
    "tpu.trace_stop"() : () -> ()
    %cst_15 = arith.constant 2.500000e-01 : f32
    %50 = vector.broadcast %cst_15 : f32 to vector<8x8x8xf32>
    %51 = arith.mulf %49, %50 : vector<8x8x8xf32>
    %cst_16 = arith.constant dense<0xFF800000> : vector<8x8xf32>
    %52 = vector.multi_reduction <maximumf>, %51, %cst_16 [2] : vector<8x8x8xf32> to vector<8x8xf32>
    %53 = vector.shape_cast %52 : vector<8x8xf32> to vector<8x8x1xf32>
    %54 = vector.broadcast %53 : vector<8x8x1xf32> to vector<8x8x8xf32>
    %55 = arith.subf %51, %54 : vector<8x8x8xf32>
    %56 = math.exp %55 : vector<8x8x8xf32>
    %cst_17 = arith.constant dense<0.000000e+00> : vector<8x8xf32>
    %57 = vector.multi_reduction <add>, %56, %cst_17 [2] : vector<8x8x8xf32> to vector<8x8xf32>
    %58 = vector.shape_cast %57 : vector<8x8xf32> to vector<8x8x1xf32>
    %59 = tpu.reciprocal %58 {approx = true} : vector<8x8x1xf32> -> vector<8x8x1xf32>
    %60 = vector.broadcast %59 : vector<8x8x1xf32> to vector<8x8x8xf32>
    %61 = arith.mulf %56, %60 : vector<8x8x8xf32>
    %62 = arith.truncf %61 : vector<8x8x8xf32> to vector<8x8x8xbf16>
    "tpu.trace_start"() <{level = 10 : i32, message = "nqk,nkd->nqd"}> : () -> ()
    %cst_18 = arith.constant dense<0.000000e+00> : vector<8x8x16xf32>
    %63 = tpu.matmul %62, %48, %cst_18 {dimension_numbers = #tpu.dot_dimension_numbers<[2], [1], [1], [2], [0, 0, 0, 1, 1, 2], [0], [0]>} : vector<8x8x8xbf16>, vector<8x8x16xbf16>, vector<8x8x16xf32> -> vector<8x8x16xf32>
    "tpu.trace_stop"() : () -> ()
    %64 = arith.truncf %63 : vector<8x8x16xf32> to vector<8x8x16xbf16>
    %c0_19 = arith.constant 0 : index
    %c0_20 = arith.constant 0 : index
    %c0_21 = arith.constant 0 : index
    %c0_22 = arith.constant 0 : index
    %65 = vector.load %arg4[%c0_19, %c0_20, %c0_21, %c0_22] : memref<2x8x16x64xbf16, #tpu.memory_space<vmem>>, vector<1x8x16x64xbf16>
    %66 = vector.shape_cast %65 : vector<1x8x16x64xbf16> to vector<8x16x64xbf16>
    "tpu.trace_start"() <{level = 10 : i32, message = "nsd,ndo->nso"}> : () -> ()
    %cst_23 = arith.constant dense<0.000000e+00> : vector<8x8x64xf32>
    %67 = tpu.matmul %64, %66, %cst_23 {dimension_numbers = #tpu.dot_dimension_numbers<[2], [1], [1], [2], [0, 0, 0, 1, 1, 2], [0], [0]>} : vector<8x8x16xbf16>, vector<8x16x64xbf16>, vector<8x8x64xf32> -> vector<8x8x64xf32>
    "tpu.trace_stop"() : () -> ()
    %68 = vector.shape_cast %67 : vector<8x8x64xf32> to vector<2x4x8x64xf32>
    %cst_24 = arith.constant dense<0.000000e+00> : vector<2x8x64xf32>
    %69 = vector.multi_reduction <add>, %68, %cst_24 [1] : vector<2x4x8x64xf32> to vector<2x8x64xf32>
    %70 = vector.shape_cast %69 : vector<2x8x64xf32> to vector<16x64xf32>
    %71 = vector.extract_strided_slice %2 {offsets = [4, 0], sizes = [1, 64], strides = [1, 1]} : vector<8x64xf32> to vector<1x64xf32>
    %72 = vector.shape_cast %71 : vector<1x64xf32> to vector<64xf32>
    %73 = vector.shape_cast %72 : vector<64xf32> to vector<1x64xf32>
    %74 = vector.broadcast %73 : vector<1x64xf32> to vector<16x64xf32>
    %75 = arith.addf %70, %74 : vector<16x64xf32>
    %76 = arith.addf %0, %75 : vector<16x64xf32>
    %77 = vector.extract_strided_slice %2 {offsets = [2, 0], sizes = [1, 64], strides = [1, 1]} : vector<8x64xf32> to vector<1x64xf32>
    %78 = vector.shape_cast %77 : vector<1x64xf32> to vector<64xf32>
    %79 = vector.extract_strided_slice %2 {offsets = [3, 0], sizes = [1, 64], strides = [1, 1]} : vector<8x64xf32> to vector<1x64xf32>
    %80 = vector.shape_cast %79 : vector<1x64xf32> to vector<64xf32>
    %cst_25 = arith.constant dense<0.000000e+00> : vector<16xf32>
    %81 = vector.multi_reduction <add>, %76, %cst_25 [1] : vector<16x64xf32> to vector<16xf32>
    %82 = vector.shape_cast %81 : vector<16xf32> to vector<16x1xf32>
    %cst_26 = arith.constant 6.400000e+01 : f32
    %83 = vector.broadcast %cst_26 : f32 to vector<16x1xf32>
    %84 = arith.divf %82, %83 : vector<16x1xf32>
    %85 = arith.mulf %76, %76 : vector<16x64xf32>
    %cst_27 = arith.constant dense<0.000000e+00> : vector<16xf32>
    %86 = vector.multi_reduction <add>, %85, %cst_27 [1] : vector<16x64xf32> to vector<16xf32>
    %87 = vector.shape_cast %86 : vector<16xf32> to vector<16x1xf32>
    %cst_28 = arith.constant 6.400000e+01 : f32
    %88 = vector.broadcast %cst_28 : f32 to vector<16x1xf32>
    %89 = arith.divf %87, %88 : vector<16x1xf32>
    %90 = arith.mulf %84, %84 : vector<16x1xf32>
    %91 = arith.subf %89, %90 : vector<16x1xf32>
    %92 = vector.broadcast %84 : vector<16x1xf32> to vector<16x64xf32>
    %93 = arith.subf %76, %92 : vector<16x64xf32>
    %cst_29 = arith.constant 9.99999974E-6 : f32
    %94 = vector.broadcast %cst_29 : f32 to vector<16x1xf32>
    %95 = arith.addf %91, %94 : vector<16x1xf32>
    %96 = math.rsqrt %95 : vector<16x1xf32>
    %97 = vector.broadcast %96 : vector<16x1xf32> to vector<16x64xf32>
    %98 = arith.mulf %93, %97 : vector<16x64xf32>
    %99 = vector.shape_cast %78 : vector<64xf32> to vector<1x64xf32>
    %100 = vector.broadcast %99 : vector<1x64xf32> to vector<16x64xf32>
    %101 = arith.mulf %98, %100 : vector<16x64xf32>
    %102 = vector.shape_cast %80 : vector<64xf32> to vector<1x64xf32>
    %103 = vector.broadcast %102 : vector<1x64xf32> to vector<16x64xf32>
    %104 = arith.addf %101, %103 : vector<16x64xf32>
    %105 = arith.truncf %104 : vector<16x64xf32> to vector<16x64xbf16>
    %c0_30 = arith.constant 0 : index
    %c0_31 = arith.constant 0 : index
    %c0_32 = arith.constant 0 : index
    %106 = vector.load %arg5[%c0_30, %c0_31, %c0_32] : memref<2x64x32xbf16, #tpu.memory_space<vmem>>, vector<1x64x32xbf16>
    %107 = vector.shape_cast %106 : vector<1x64x32xbf16> to vector<64x32xbf16>
    %cst_33 = arith.constant dense<0.000000e+00> : vector<16x32xf32>
    %108 = tpu.matmul %105, %107, %cst_33 {dimension_numbers = #tpu.dot_dimension_numbers<[1], [0], [0], [1], [0, 0, 1, 1], [], []>} : vector<16x64xbf16>, vector<64x32xbf16>, vector<16x32xf32> -> vector<16x32xf32>
    %109 = vector.extract_strided_slice %2 {offsets = [6, 0], sizes = [1, 64], strides = [1, 1]} : vector<8x64xf32> to vector<1x64xf32>
    %110 = vector.shape_cast %109 : vector<1x64xf32> to vector<64xf32>
    %111 = vector.extract_strided_slice %110 {offsets = [0], sizes = [32], strides = [1]} : vector<64xf32> to vector<32xf32>
    %112 = vector.shape_cast %111 : vector<32xf32> to vector<1x32xf32>
    %113 = vector.broadcast %112 : vector<1x32xf32> to vector<16x32xf32>
    %114 = arith.addf %108, %113 : vector<16x32xf32>
    %cst_34 = arith.constant 0.000000e+00 : f32
    %115 = vector.broadcast %cst_34 : f32 to vector<16x32xf32>
    %116 = arith.maximumf %114, %115 : vector<16x32xf32>
    %117 = arith.truncf %116 : vector<16x32xf32> to vector<16x32xbf16>
    %c0_35 = arith.constant 0 : index
    %c0_36 = arith.constant 0 : index
    %c0_37 = arith.constant 0 : index
    %118 = vector.load %arg6[%c0_35, %c0_36, %c0_37] : memref<2x32x64xbf16, #tpu.memory_space<vmem>>, vector<1x32x64xbf16>
    %119 = vector.shape_cast %118 : vector<1x32x64xbf16> to vector<32x64xbf16>
    %cst_38 = arith.constant dense<0.000000e+00> : vector<16x64xf32>
    %120 = tpu.matmul %117, %119, %cst_38 {dimension_numbers = #tpu.dot_dimension_numbers<[1], [0], [0], [1], [0, 0, 1, 1], [], []>} : vector<16x32xbf16>, vector<32x64xbf16>, vector<16x64xf32> -> vector<16x64xf32>
    %121 = vector.extract_strided_slice %2 {offsets = [5, 0], sizes = [1, 64], strides = [1, 1]} : vector<8x64xf32> to vector<1x64xf32>
    %122 = vector.shape_cast %121 : vector<1x64xf32> to vector<64xf32>
    %123 = vector.shape_cast %122 : vector<64xf32> to vector<1x64xf32>
    %124 = vector.broadcast %123 : vector<1x64xf32> to vector<16x64xf32>
    %125 = arith.addf %120, %124 : vector<16x64xf32>
    %126 = arith.addf %76, %125 : vector<16x64xf32>
    %c1 = arith.constant 1 : index
    %c0_39 = arith.constant 0 : index
    %c0_40 = arith.constant 0 : index
    %127 = vector.load %arg1[%c1, %c0_39, %c0_40] : memref<2x8x64xf32, #tpu.memory_space<vmem>>, vector<1x8x64xf32>
    %128 = vector.shape_cast %127 : vector<1x8x64xf32> to vector<8x64xf32>
    %129 = vector.extract_strided_slice %128 {offsets = [0, 0], sizes = [1, 64], strides = [1, 1]} : vector<8x64xf32> to vector<1x64xf32>
    %130 = vector.shape_cast %129 : vector<1x64xf32> to vector<64xf32>
    %131 = vector.extract_strided_slice %128 {offsets = [1, 0], sizes = [1, 64], strides = [1, 1]} : vector<8x64xf32> to vector<1x64xf32>
    %132 = vector.shape_cast %131 : vector<1x64xf32> to vector<64xf32>
    %cst_41 = arith.constant dense<0.000000e+00> : vector<16xf32>
    %133 = vector.multi_reduction <add>, %126, %cst_41 [1] : vector<16x64xf32> to vector<16xf32>
    %134 = vector.shape_cast %133 : vector<16xf32> to vector<16x1xf32>
    %cst_42 = arith.constant 6.400000e+01 : f32
    %135 = vector.broadcast %cst_42 : f32 to vector<16x1xf32>
    %136 = arith.divf %134, %135 : vector<16x1xf32>
    %137 = arith.mulf %126, %126 : vector<16x64xf32>
    %cst_43 = arith.constant dense<0.000000e+00> : vector<16xf32>
    %138 = vector.multi_reduction <add>, %137, %cst_43 [1] : vector<16x64xf32> to vector<16xf32>
    %139 = vector.shape_cast %138 : vector<16xf32> to vector<16x1xf32>
    %cst_44 = arith.constant 6.400000e+01 : f32
    %140 = vector.broadcast %cst_44 : f32 to vector<16x1xf32>
    %141 = arith.divf %139, %140 : vector<16x1xf32>
    %142 = arith.mulf %136, %136 : vector<16x1xf32>
    %143 = arith.subf %141, %142 : vector<16x1xf32>
    %144 = vector.broadcast %136 : vector<16x1xf32> to vector<16x64xf32>
    %145 = arith.subf %126, %144 : vector<16x64xf32>
    %cst_45 = arith.constant 9.99999974E-6 : f32
    %146 = vector.broadcast %cst_45 : f32 to vector<16x1xf32>
    %147 = arith.addf %143, %146 : vector<16x1xf32>
    %148 = math.rsqrt %147 : vector<16x1xf32>
    %149 = vector.broadcast %148 : vector<16x1xf32> to vector<16x64xf32>
    %150 = arith.mulf %145, %149 : vector<16x64xf32>
    %151 = vector.shape_cast %130 : vector<64xf32> to vector<1x64xf32>
    %152 = vector.broadcast %151 : vector<1x64xf32> to vector<16x64xf32>
    %153 = arith.mulf %150, %152 : vector<16x64xf32>
    %154 = vector.shape_cast %132 : vector<64xf32> to vector<1x64xf32>
    %155 = vector.broadcast %154 : vector<1x64xf32> to vector<16x64xf32>
    %156 = arith.addf %153, %155 : vector<16x64xf32>
    %157 = arith.truncf %156 : vector<16x64xf32> to vector<16x64xbf16>
    %c1_46 = arith.constant 1 : index
    %c0_47 = arith.constant 0 : index
    %c0_48 = arith.constant 0 : index
    %158 = vector.load %arg3[%c1_46, %c0_47, %c0_48] : memref<2x64x192xbf16, #tpu.memory_space<vmem>>, vector<1x64x192xbf16>
    %159 = vector.shape_cast %158 : vector<1x64x192xbf16> to vector<64x192xbf16>
    %cst_49 = arith.constant dense<0.000000e+00> : vector<16x192xf32>
    %160 = tpu.matmul %157, %159, %cst_49 {dimension_numbers = #tpu.dot_dimension_numbers<[1], [0], [0], [1], [0, 0, 1, 1], [], []>} : vector<16x64xbf16>, vector<64x192xbf16>, vector<16x192xf32> -> vector<16x192xf32>
    %c1_50 = arith.constant 1 : index
    %c0_51 = arith.constant 0 : index
    %161 = vector.load %arg2[%c1_50, %c0_51] : memref<2x192xf32, #tpu.memory_space<vmem>>, vector<1x192xf32>
    %162 = vector.shape_cast %161 : vector<1x192xf32> to vector<192xf32>
    %163 = vector.shape_cast %162 : vector<192xf32> to vector<1x192xf32>
    %164 = vector.broadcast %163 : vector<1x192xf32> to vector<16x192xf32>
    %165 = arith.addf %160, %164 : vector<16x192xf32>
    %166 = arith.truncf %165 : vector<16x192xf32> to vector<16x192xbf16>
    %167 = vector.shape_cast %166 : vector<16x192xbf16> to vector<2x8x12x16xbf16>
    %168 = tpu.transpose %167, [0, 2, 1, 3] : vector<2x8x12x16xbf16> -> vector<2x12x8x16xbf16>
    %169 = vector.extract_strided_slice %168 {offsets = [0, 0, 0, 0], sizes = [2, 4, 8, 16], strides = [1, 1, 1, 1]} : vector<2x12x8x16xbf16> to vector<2x4x8x16xbf16>
    %170 = vector.shape_cast %169 : vector<2x4x8x16xbf16> to vector<8x8x16xbf16>
    %171 = vector.extract_strided_slice %168 {offsets = [0, 4, 0, 0], sizes = [2, 4, 8, 16], strides = [1, 1, 1, 1]} : vector<2x12x8x16xbf16> to vector<2x4x8x16xbf16>
    %172 = vector.shape_cast %171 : vector<2x4x8x16xbf16> to vector<8x8x16xbf16>
    %173 = vector.extract_strided_slice %168 {offsets = [0, 8, 0, 0], sizes = [2, 4, 8, 16], strides = [1, 1, 1, 1]} : vector<2x12x8x16xbf16> to vector<2x4x8x16xbf16>
    %174 = vector.shape_cast %173 : vector<2x4x8x16xbf16> to vector<8x8x16xbf16>
    "tpu.trace_start"() <{level = 10 : i32, message = "nqd,nkd->nqk"}> : () -> ()
    %cst_52 = arith.constant dense<0.000000e+00> : vector<8x8x8xf32>
    %175 = tpu.matmul %170, %172, %cst_52 {dimension_numbers = #tpu.dot_dimension_numbers<[2], [2], [1], [1], [0, 0, 0, 1, 1, 1], [0], [0]>} : vector<8x8x16xbf16>, vector<8x8x16xbf16>, vector<8x8x8xf32> -> vector<8x8x8xf32>
    "tpu.trace_stop"() : () -> ()
    %cst_53 = arith.constant 2.500000e-01 : f32
    %176 = vector.broadcast %cst_53 : f32 to vector<8x8x8xf32>
    %177 = arith.mulf %175, %176 : vector<8x8x8xf32>
    %cst_54 = arith.constant dense<0xFF800000> : vector<8x8xf32>
    %178 = vector.multi_reduction <maximumf>, %177, %cst_54 [2] : vector<8x8x8xf32> to vector<8x8xf32>
    %179 = vector.shape_cast %178 : vector<8x8xf32> to vector<8x8x1xf32>
    %180 = vector.broadcast %179 : vector<8x8x1xf32> to vector<8x8x8xf32>
    %181 = arith.subf %177, %180 : vector<8x8x8xf32>
    %182 = math.exp %181 : vector<8x8x8xf32>
    %cst_55 = arith.constant dense<0.000000e+00> : vector<8x8xf32>
    %183 = vector.multi_reduction <add>, %182, %cst_55 [2] : vector<8x8x8xf32> to vector<8x8xf32>
    %184 = vector.shape_cast %183 : vector<8x8xf32> to vector<8x8x1xf32>
    %185 = tpu.reciprocal %184 {approx = true} : vector<8x8x1xf32> -> vector<8x8x1xf32>
    %186 = vector.broadcast %185 : vector<8x8x1xf32> to vector<8x8x8xf32>
    %187 = arith.mulf %182, %186 : vector<8x8x8xf32>
    %188 = arith.truncf %187 : vector<8x8x8xf32> to vector<8x8x8xbf16>
    "tpu.trace_start"() <{level = 10 : i32, message = "nqk,nkd->nqd"}> : () -> ()
    %cst_56 = arith.constant dense<0.000000e+00> : vector<8x8x16xf32>
    %189 = tpu.matmul %188, %174, %cst_56 {dimension_numbers = #tpu.dot_dimension_numbers<[2], [1], [1], [2], [0, 0, 0, 1, 1, 2], [0], [0]>} : vector<8x8x8xbf16>, vector<8x8x16xbf16>, vector<8x8x16xf32> -> vector<8x8x16xf32>
    "tpu.trace_stop"() : () -> ()
    %190 = arith.truncf %189 : vector<8x8x16xf32> to vector<8x8x16xbf16>
    %c1_57 = arith.constant 1 : index
    %c0_58 = arith.constant 0 : index
    %c0_59 = arith.constant 0 : index
    %c0_60 = arith.constant 0 : index
    %191 = vector.load %arg4[%c1_57, %c0_58, %c0_59, %c0_60] : memref<2x8x16x64xbf16, #tpu.memory_space<vmem>>, vector<1x8x16x64xbf16>
    %192 = vector.shape_cast %191 : vector<1x8x16x64xbf16> to vector<8x16x64xbf16>
    "tpu.trace_start"() <{level = 10 : i32, message = "nsd,ndo->nso"}> : () -> ()
    %cst_61 = arith.constant dense<0.000000e+00> : vector<8x8x64xf32>
    %193 = tpu.matmul %190, %192, %cst_61 {dimension_numbers = #tpu.dot_dimension_numbers<[2], [1], [1], [2], [0, 0, 0, 1, 1, 2], [0], [0]>} : vector<8x8x16xbf16>, vector<8x16x64xbf16>, vector<8x8x64xf32> -> vector<8x8x64xf32>
    "tpu.trace_stop"() : () -> ()
    %194 = vector.shape_cast %193 : vector<8x8x64xf32> to vector<2x4x8x64xf32>
    %cst_62 = arith.constant dense<0.000000e+00> : vector<2x8x64xf32>
    %195 = vector.multi_reduction <add>, %194, %cst_62 [1] : vector<2x4x8x64xf32> to vector<2x8x64xf32>
    %196 = vector.shape_cast %195 : vector<2x8x64xf32> to vector<16x64xf32>
    %197 = vector.extract_strided_slice %128 {offsets = [4, 0], sizes = [1, 64], strides = [1, 1]} : vector<8x64xf32> to vector<1x64xf32>
    %198 = vector.shape_cast %197 : vector<1x64xf32> to vector<64xf32>
    %199 = vector.shape_cast %198 : vector<64xf32> to vector<1x64xf32>
    %200 = vector.broadcast %199 : vector<1x64xf32> to vector<16x64xf32>
    %201 = arith.addf %196, %200 : vector<16x64xf32>
    %202 = arith.addf %126, %201 : vector<16x64xf32>
    %203 = vector.extract_strided_slice %128 {offsets = [2, 0], sizes = [1, 64], strides = [1, 1]} : vector<8x64xf32> to vector<1x64xf32>
    %204 = vector.shape_cast %203 : vector<1x64xf32> to vector<64xf32>
    %205 = vector.extract_strided_slice %128 {offsets = [3, 0], sizes = [1, 64], strides = [1, 1]} : vector<8x64xf32> to vector<1x64xf32>
    %206 = vector.shape_cast %205 : vector<1x64xf32> to vector<64xf32>
    %cst_63 = arith.constant dense<0.000000e+00> : vector<16xf32>
    %207 = vector.multi_reduction <add>, %202, %cst_63 [1] : vector<16x64xf32> to vector<16xf32>
    %208 = vector.shape_cast %207 : vector<16xf32> to vector<16x1xf32>
    %cst_64 = arith.constant 6.400000e+01 : f32
    %209 = vector.broadcast %cst_64 : f32 to vector<16x1xf32>
    %210 = arith.divf %208, %209 : vector<16x1xf32>
    %211 = arith.mulf %202, %202 : vector<16x64xf32>
    %cst_65 = arith.constant dense<0.000000e+00> : vector<16xf32>
    %212 = vector.multi_reduction <add>, %211, %cst_65 [1] : vector<16x64xf32> to vector<16xf32>
    %213 = vector.shape_cast %212 : vector<16xf32> to vector<16x1xf32>
    %cst_66 = arith.constant 6.400000e+01 : f32
    %214 = vector.broadcast %cst_66 : f32 to vector<16x1xf32>
    %215 = arith.divf %213, %214 : vector<16x1xf32>
    %216 = arith.mulf %210, %210 : vector<16x1xf32>
    %217 = arith.subf %215, %216 : vector<16x1xf32>
    %218 = vector.broadcast %210 : vector<16x1xf32> to vector<16x64xf32>
    %219 = arith.subf %202, %218 : vector<16x64xf32>
    %cst_67 = arith.constant 9.99999974E-6 : f32
    %220 = vector.broadcast %cst_67 : f32 to vector<16x1xf32>
    %221 = arith.addf %217, %220 : vector<16x1xf32>
    %222 = math.rsqrt %221 : vector<16x1xf32>
    %223 = vector.broadcast %222 : vector<16x1xf32> to vector<16x64xf32>
    %224 = arith.mulf %219, %223 : vector<16x64xf32>
    %225 = vector.shape_cast %204 : vector<64xf32> to vector<1x64xf32>
    %226 = vector.broadcast %225 : vector<1x64xf32> to vector<16x64xf32>
    %227 = arith.mulf %224, %226 : vector<16x64xf32>
    %228 = vector.shape_cast %206 : vector<64xf32> to vector<1x64xf32>
    %229 = vector.broadcast %228 : vector<1x64xf32> to vector<16x64xf32>
    %230 = arith.addf %227, %229 : vector<16x64xf32>
    %231 = arith.truncf %230 : vector<16x64xf32> to vector<16x64xbf16>
    %c1_68 = arith.constant 1 : index
    %c0_69 = arith.constant 0 : index
    %c0_70 = arith.constant 0 : index
    %232 = vector.load %arg5[%c1_68, %c0_69, %c0_70] : memref<2x64x32xbf16, #tpu.memory_space<vmem>>, vector<1x64x32xbf16>
    %233 = vector.shape_cast %232 : vector<1x64x32xbf16> to vector<64x32xbf16>
    %cst_71 = arith.constant dense<0.000000e+00> : vector<16x32xf32>
    %234 = tpu.matmul %231, %233, %cst_71 {dimension_numbers = #tpu.dot_dimension_numbers<[1], [0], [0], [1], [0, 0, 1, 1], [], []>} : vector<16x64xbf16>, vector<64x32xbf16>, vector<16x32xf32> -> vector<16x32xf32>
    %235 = vector.extract_strided_slice %128 {offsets = [6, 0], sizes = [1, 64], strides = [1, 1]} : vector<8x64xf32> to vector<1x64xf32>
    %236 = vector.shape_cast %235 : vector<1x64xf32> to vector<64xf32>
    %237 = vector.extract_strided_slice %236 {offsets = [0], sizes = [32], strides = [1]} : vector<64xf32> to vector<32xf32>
    %238 = vector.shape_cast %237 : vector<32xf32> to vector<1x32xf32>
    %239 = vector.broadcast %238 : vector<1x32xf32> to vector<16x32xf32>
    %240 = arith.addf %234, %239 : vector<16x32xf32>
    %cst_72 = arith.constant 0.000000e+00 : f32
    %241 = vector.broadcast %cst_72 : f32 to vector<16x32xf32>
    %242 = arith.maximumf %240, %241 : vector<16x32xf32>
    %243 = arith.truncf %242 : vector<16x32xf32> to vector<16x32xbf16>
    %c1_73 = arith.constant 1 : index
    %c0_74 = arith.constant 0 : index
    %c0_75 = arith.constant 0 : index
    %244 = vector.load %arg6[%c1_73, %c0_74, %c0_75] : memref<2x32x64xbf16, #tpu.memory_space<vmem>>, vector<1x32x64xbf16>
    %245 = vector.shape_cast %244 : vector<1x32x64xbf16> to vector<32x64xbf16>
    %cst_76 = arith.constant dense<0.000000e+00> : vector<16x64xf32>
    %246 = tpu.matmul %243, %245, %cst_76 {dimension_numbers = #tpu.dot_dimension_numbers<[1], [0], [0], [1], [0, 0, 1, 1], [], []>} : vector<16x32xbf16>, vector<32x64xbf16>, vector<16x64xf32> -> vector<16x64xf32>
    %247 = vector.extract_strided_slice %128 {offsets = [5, 0], sizes = [1, 64], strides = [1, 1]} : vector<8x64xf32> to vector<1x64xf32>
    %248 = vector.shape_cast %247 : vector<1x64xf32> to vector<64xf32>
    %249 = vector.shape_cast %248 : vector<64xf32> to vector<1x64xf32>
    %250 = vector.broadcast %249 : vector<1x64xf32> to vector<16x64xf32>
    %251 = arith.addf %246, %250 : vector<16x64xf32>
    %252 = arith.addf %202, %251 : vector<16x64xf32>
    %c0_77 = arith.constant 0 : index
    %c0_78 = arith.constant 0 : index
    %253 = vector.load %arg10[%c0_77, %c0_78] : memref<16x64xf32, #tpu.memory_space<vmem>>, vector<16x64xf32>
    tpu.vector_store %arg10[%c0_77, %c0_78], %252 {strides = array<i32>} : memref<16x64xf32, #tpu.memory_space<vmem>>, vector<16x64xf32>,
    %c0_79 = arith.constant 0 : index
    %c0_80 = arith.constant 0 : index
    %254 = tpu.strided_load %arg10[%c0_79, %c0_80] {strides = array<i32: 8, 1>} : memref<16x64xf32, #tpu.memory_space<vmem>>, vector<2x64xf32>
    %c0_81 = arith.constant 0 : index
    %c0_82 = arith.constant 0 : index
    %255 = vector.load %arg7[%c0_81, %c0_82] : memref<3x64xf32, #tpu.memory_space<vmem>>, vector<3x64xf32>
    %256 = vector.extract_strided_slice %255 {offsets = [0, 0], sizes = [1, 64], strides = [1, 1]} : vector<3x64xf32> to vector<1x64xf32>
    %257 = vector.shape_cast %256 : vector<1x64xf32> to vector<64xf32>
    %258 = vector.extract_strided_slice %255 {offsets = [1, 0], sizes = [1, 64], strides = [1, 1]} : vector<3x64xf32> to vector<1x64xf32>
    %259 = vector.shape_cast %258 : vector<1x64xf32> to vector<64xf32>
    %cst_83 = arith.constant dense<0.000000e+00> : vector<2xf32>
    %260 = vector.multi_reduction <add>, %254, %cst_83 [1] : vector<2x64xf32> to vector<2xf32>
    %261 = vector.shape_cast %260 : vector<2xf32> to vector<2x1xf32>
    %cst_84 = arith.constant 6.400000e+01 : f32
    %262 = vector.broadcast %cst_84 : f32 to vector<2x1xf32>
    %263 = arith.divf %261, %262 : vector<2x1xf32>
    %264 = arith.mulf %254, %254 : vector<2x64xf32>
    %cst_85 = arith.constant dense<0.000000e+00> : vector<2xf32>
    %265 = vector.multi_reduction <add>, %264, %cst_85 [1] : vector<2x64xf32> to vector<2xf32>
    %266 = vector.shape_cast %265 : vector<2xf32> to vector<2x1xf32>
    %cst_86 = arith.constant 6.400000e+01 : f32
    %267 = vector.broadcast %cst_86 : f32 to vector<2x1xf32>
    %268 = arith.divf %266, %267 : vector<2x1xf32>
    %269 = arith.mulf %263, %263 : vector<2x1xf32>
    %270 = arith.subf %268, %269 : vector<2x1xf32>
    %271 = vector.broadcast %263 : vector<2x1xf32> to vector<2x64xf32>
    %272 = arith.subf %254, %271 : vector<2x64xf32>
    %cst_87 = arith.constant 9.99999974E-6 : f32
    %273 = vector.broadcast %cst_87 : f32 to vector<2x1xf32>
    %274 = arith.addf %270, %273 : vector<2x1xf32>
    %275 = math.rsqrt %274 : vector<2x1xf32>
    %276 = vector.broadcast %275 : vector<2x1xf32> to vector<2x64xf32>
    %277 = arith.mulf %272, %276 : vector<2x64xf32>
    %278 = vector.shape_cast %257 : vector<64xf32> to vector<1x64xf32>
    %279 = vector.broadcast %278 : vector<1x64xf32> to vector<2x64xf32>
    %280 = arith.mulf %277, %279 : vector<2x64xf32>
    %281 = vector.shape_cast %259 : vector<64xf32> to vector<1x64xf32>
    %282 = vector.broadcast %281 : vector<1x64xf32> to vector<2x64xf32>
    %283 = arith.addf %280, %282 : vector<2x64xf32>
    %284 = vector.shape_cast %283 : vector<2x64xf32> to vector<2x1x64xf32>
    %c0_88 = arith.constant 0 : index
    %c0_89 = arith.constant 0 : index
    %285 = vector.load %arg8[%c0_88, %c0_89] : memref<1x64xf32, #tpu.memory_space<vmem>>, vector<1x64xf32>
    %286 = vector.shape_cast %285 : vector<1x64xf32> to vector<1x1x64xf32>
    %287 = vector.broadcast %286 : vector<1x1x64xf32> to vector<2x1x64xf32>
    %288 = arith.mulf %284, %287 : vector<2x1x64xf32>
    %cst_90 = arith.constant dense<0.000000e+00> : vector<2x1xf32>
    %289 = vector.multi_reduction <add>, %288, %cst_90 [2] : vector<2x1x64xf32> to vector<2x1xf32>
    %290 = vector.extract_strided_slice %255 {offsets = [2, 0], sizes = [1, 64], strides = [1, 1]} : vector<3x64xf32> to vector<1x64xf32>
    %291 = vector.shape_cast %290 : vector<1x64xf32> to vector<64xf32>
    %292 = vector.extract_strided_slice %291 {offsets = [0], sizes = [1], strides = [1]} : vector<64xf32> to vector<1xf32>
    %293 = vector.shape_cast %292 : vector<1xf32> to vector<1x1xf32>
    %294 = vector.broadcast %293 : vector<1x1xf32> to vector<2x1xf32>
    %295 = arith.addf %289, %294 : vector<2x1xf32>
    %c0_91 = arith.constant 0 : index
    %c0_92 = arith.constant 0 : index
    %296 = vector.load %arg9[%c0_91, %c0_92] : memref<2x1xf32, #tpu.memory_space<vmem>>, vector<2x1xf32>
    tpu.vector_store %arg9[%c0_91, %c0_92], %295 {strides = array<i32>} : memref<2x1xf32, #tpu.memory_space<vmem>>, vector<2x1xf32>,
    return
  }
}

</mosaic_0001>

<bundles_post_ra>
// kernel: net_stage2_forward.1
= control target key start
LH: loop header
LB: loop body
LE: loop exit
PB: predicated region body
PF: predicated region fallthrough
CT: control target
= control target key end

     0   :  { %vm36_vm0 = vcmask 523264   ;;  %v5436_v9 = vmov 0   ;;  %v68_v29 = vlaneseq  ;;  %s5437_s12 = smov 96   ;;  %s5438_s13 = smov 112   ;;  %v5444_v62 = vmov 0.0   ;;  %s6377_s0 = inlined_call_operand.vmem [shape: f32[16,64], index: 0, kind: input, shape index: {}]   ;;  %s6378_s3 = inlined_call_operand.vmem [shape: bf16[2,64,192], index: 3, kind: input, shape index: {}]   ;;  %s6379_s1 = inlined_call_operand.vmem [shape: f32[2,8,64], index: 1, kind: input, shape index: {}]   ;;  %s6380_s2 = inlined_call_operand.vmem [shape: f32[2,192], index: 2, kind: input, shape index: {}]   ;;  %s6381_s4 = inlined_call_operand.vmem [shape: bf16[2,8,16,64], index: 4, kind: input, shape index: {}]   ;;  %s6382_s5 = inlined_call_operand.vmem [shape: bf16[2,64,32], index: 5, kind: input, shape index: {}]   ;;  %s6383_s6 = inlined_call_operand.vmem [shape: bf16[2,32,64], index: 6, kind: input, shape index: {}]   ;;  %s6384_s7 = inlined_call_operand.vmem [shape: f32[3,64], index: 7, kind: input, shape index: {}]   ;;  %s6385_s8 = inlined_call_operand.vmem [shape: f32[1,64], index: 8, kind: input, shape index: {}]   ;;  %s6386_s9 = inlined_call_operand.vmem [shape: f32[2,1], index: 9, kind: output, shape index: {}]  }
   0x1   :  { %v33_v0 = vld [vmem:[%s6377_s0] sm:$0xff]  ;;  %v34_v1 = vld [vmem:[%s6377_s0 + $0x8] sm:$0xff]  ;;  %176 = vmatprep.mubr.bf16.mxu0 %v5436_v9  ;;  %v5301_v11 = vld [vmem:[%s6378_s3 + $0x14] ss:$8 sps:$4 sm:$0xff]   ;;  %s5439_s14 = smov 80   ;;  %s5440_s15 = smov 48   ;;  %4957 = vmatprep.subr.bf16.mxu1 %v5444_v62 }
   0x2   :  { %v37_v2 = vsel %vm36_vm0, %v33_v0, 0.0  ;;  %v46_v3 = vmul.f32 %v33_v0, %v33_v0  ;;  %v47_v4 = vmul.f32 %v34_v1, %v34_v1  ;;  %v40_v6 = vsel %vm36_vm0, %v34_v1, 0.0  ;;  %v5298_v8 = vld [vmem:[%s6378_s3 + $0x4] ss:$8 sps:$4 sm:$0xff]   ;;  %v5300_v10 = vld [vmem:[%s6378_s3] ss:$8 sps:$4 sm:$0xff]  }
   0x3   :  { %38 = vadd.xlane.f32.xlu0 %v37_v2  ;;  %144 = vmatprep.subr.bf16.mxu0 %v5298_v8  ;;  %v5303_v12 = vld [vmem:[%s6378_s3 + $0x10] ss:$8 sps:$4 sm:$0xff]   ;;  %v5304_v13 = vld [vmem:[%s6378_s3 + $0x24] ss:$8 sps:$4 sm:$0xff]   ;;  %v5306_v14 = vld [vmem:[%s6378_s3 + $0x20] ss:$8 sps:$4 sm:$0xff]  }
   0x4   :  { %v48_v5 = vsel %vm36_vm0, %v46_v3, 0.0  ;;  %v51_v7 = vsel %vm36_vm0, %v47_v4, 0.0  ;;  %145 = vmatpush1.bf16.msra.mxu0 %v5300_v10  ;;  %v5307_v15 = vld [vmem:[%s6378_s3 + $0x34] ss:$8 sps:$4 sm:$0xff]   ;;  %v5309_v16 = vld [vmem:[%s6378_s3 + $0x30] ss:$8 sps:$4 sm:$0xff]  }
   0x5   :  { %49 = vadd.xlane.f32.xlu1 %v48_v5  ;;  %146 = vmatprep.subr.bf16.mxu0 %v5301_v11  ;;  %v5534_v32 = vshrl.u32 %v68_v29, 7  ;;  %v35_v34 = vld [vmem:[%s6379_s1] sm:$0xff]  ;;  %s5441_s16 = smov 64   ;;  %s5442_s17 = smov 16   ;;  %vm5445_vm1 = vmmov 0   ;;  %vm841_vm2 = vcmask 130048  }
   0x6   :  { %v89_v49 = vld [vmem:[%s6380_s2] ss:$2 sm:$0x3]  ;;  %s5443_s18 = smov 32   ;;  %4959 = vmatprep.mubr.msk.bf16.mxu1 %vm5445_vm1, %v5444_v62  ;;  %v5447_v5 = vmov 1934713408  }
   0x7   :  { %41 = vadd.xlane.f32.xlu0 %v40_v6  ;;  %v5537_v33 = vsub.s32 0, %v5534_v32  ;;  %v5544_v39 = vsub.s32 1, %v5534_v32  ;;  %v330_v6 = vunpack.c.l.s4 %v5447_v5  ;;  %vm1218_vm3 = vcmask 64512  }
   0x8   :  { %147 = vmatpush1.bf16.msra.mxu0 %v5303_v12  ;;  %vm1318_vm4 = vcmask 1043456   ;;  %vm2268_vm5 = vcmask 261120   ;;  %vm4593_vm6 = vcmask 517120   ;;  %vm4647_vm7 = vcmask 516096  }
   0x9   :  { %52 = vadd.xlane.f32.xlu1 %v51_v7  ;;  %148 = vmatprep.subr.bf16.mxu0 %v5304_v13  ;;  %v71_v38 = vrot.slane %v35_v34, %v5537_v33  ;;  %v77_v44 = vrot.slane %v35_v34, %v5544_v39  ;;  %v94_v50 = vrot.slane %v89_v49, %v5537_v33  ;;  %v331_v12 = vunpack.c.0.s8 %v330_v6 }
   0xa   :  { %v98_v52 = vrot.slane %v89_v49, %v5544_v39  ;;  %vm4668_vm8 = vcmask 1041409   ;;  %vm4671_vm9 = vcmask 1024  }
   0xb   :  { %v5572_v29 = vsub.s32 %v331_v12, %v5534_v32 }
   0xc   :  { %149 = vmatpush1.bf16.msra.mxu0 %v5306_v14 }
   0xd   :  { %150 = vmatprep.subr.bf16.mxu0 %v5307_v15 }
  0x10   :  { %151 = vmatpush1.bf16.msra.mxu0 %v5309_v16 }
  0x11   :  { %4969 = vmatprep.subr.bf16.mxu0 %v5444_v62 }
  0x90   :  { %v39_v17 = vpop.xlane.xlu0 %38 }
  0x91   :  { %v44_v18 = vmul.f32 0.015625, %v39_v17 }
  0x92   :  { %v50_v19 = vpop.xlane.xlu1 %49 }
  0x93   :  { %v56_v20 = vmul.f32 %v44_v18, %v44_v18  ;;  %v54_v21 = vmul.f32 0.015625, %v50_v19  ;;  %v60_v35 = vsub.f32 %v33_v0, %v44_v18 }
  0x94   :  { %v42_v22 = vpop.xlane.xlu0 %41 }
  0x95   :  { %v58_v23 = vsub.f32 %v54_v21, %v56_v20  ;;  %v45_v24 = vmul.f32 0.015625, %v42_v22 }
  0x96   :  { %v53_v25 = vpop.xlane.xlu1 %52 }
  0x97   :  { %v62_v26 = vadd.f32 1e-05, %v58_v23  ;;  %v57_v27 = vmul.f32 %v45_v24, %v45_v24  ;;  %v55_v28 = vmul.f32 0.015625, %v53_v25  ;;  %v61_v40 = vsub.f32 %v34_v1, %v45_v24 }
  0x98   :  { %v5446_v1 = vmov 1983009808  }
  0x99   :  { %5350 = vrsqrt.f32 %v62_v26  ;;  %v59_v30 = vsub.f32 %v55_v28, %v57_v27  ;;  %v268_v2 = vunpack.c.l.s4 %v5446_v1 }
  0x9b   :  { %v63_v31 = vadd.f32 1e-05, %v59_v30  ;;  %v269_v7 = vunpack.c.0.s8 %v268_v2 }
  0x9d   :  { %5352 = vrsqrt.f32 %v63_v31  ;;  %v5569_v17 = vsub.s32 %v269_v7, %v5534_v32 }
  0xa3   :  { %v5351_v36 = vpop.eup %5350 }
  0xa4   :  { %v66_v37 = vmul.f32 %v5351_v36, %v60_v35 }
  0xa6   :  { %v72_v43 = vmul.f32 %v71_v38, %v66_v37 }
  0xa7   :  { %v5353_v41 = vpop.eup %5352 }
  0xa8   :  { %v67_v42 = vmul.f32 %v5353_v41, %v61_v40  ;;  %v78_v46 = vadd.f32 %v77_v44, %v72_v43 }
  0xaa   :  { %v73_v45 = vmul.f32 %v71_v38, %v67_v42 }
  0xac   :  { %v79_v47 = vadd.f32 %v77_v44, %v73_v45 }
  0xae   :  { %v80_v48 = vpack.c.bf16 %v79_v47, %v78_v46 }
  0xb0   :  { %4685 = vmatmul.mubr.msk.bf16.vlgmr.msra.gmra.mrb[0].mxu0 %vm36_vm0, %v80_v48 }
  0xb1   :  { %4971 = vmatprep.mubr.msk.bf16.mxu0 %vm5445_vm1, %v5444_v62 }
 0x183   :  { %v178_v51 = vpop.f32.mrb[0].mxu0 }
 0x184   :  { %v180_v53 = vpop.f32.mrb[1].mxu0  ;;  %v179_v55 = vadd.f32 %v178_v51, %v94_v50 }
 0x185   :  { %v182_v54 = vpop.f32.mrb[2].mxu0  ;;  %v181_v58 = vadd.f32 %v180_v53, %v98_v52 }
 0x186   :  { %v183_v56 = vadd.f32 %v182_v54, %v94_v50  ;;  %v184_v57 = vpop.f32.mrb[3].mxu0 }
 0x187   :  { %v185_v59 = vadd.f32 %v184_v57, %v98_v52 }
 0x188   :  { %v187_v60 = vpack.c.bf16 %v183_v56, %v179_v55 }
 0x189   :  { %v5553_v61 = vpack.c.bf16 %v185_v59, %v181_v58 }
 0x18a   :  { %192 = vrot.lane.b32.xlu1 %v187_v60, %s5437_s12  ;;  %190 = vrot.lane.b32.xlu0 %v187_v60, %s5438_s13  ;;  %v215_v18 = vshrl.u32 %v187_v60, 16 }
 0x18e   :  { %194 = vrot.lane.b32.xlu1 %v187_v60, %s5439_s14  ;;  %198 = vrot.lane.b32.xlu0 %v187_v60, %s5440_s15 }
 0x192   :  { %196 = vrot.lane.b32.xlu1 %v187_v60, %s5441_s16  ;;  %202 = vrot.lane.b32.xlu0 %v187_v60, %s5442_s17 }
 0x196   :  { %200 = vrot.lane.b32.xlu1 %v187_v60, %s5443_s18 }
 0x1fc   :  { %v193_v63 = vpop.permute.xlu1 %192  ;;  %v191_v0 = vpop.permute.xlu0 %190 }
 0x1fd   :  { %v213_v13 = vpack.i.b16 %v191_v0, %v187_v60  ;;  %v216_v14 = vshrl.u32 %v191_v0, 16  ;;  %v223_v21 = vshrl.u32 %v193_v63, 16 }
 0x1ff   :  { %v217_v30 = vpack.i.b16 %v216_v14, %v215_v18 }
 0x200   :  { %v195_v3 = vpop.permute.xlu1 %194  ;;  %v199_v4 = vpop.permute.xlu0 %198 }
 0x201   :  { %v232_v15 = vshrl.u32 %v199_v4, 16  ;;  %v224_v19 = vshrl.u32 %v195_v3, 16  ;;  %v221_v25 = vpack.i.b16 %v195_v3, %v193_v63 }
 0x203   :  { %v225_v31 = vpack.i.b16 %v224_v19, %v223_v21 }
 0x204   :  { %v197_v8 = vpop.permute.xlu1 %196  ;;  %v203_v16 = vpop.permute.xlu0 %202 }
 0x205   :  { %v229_v10 = vpack.i.b16 %v199_v4, %v197_v8  ;;  %v231_v11 = vshrl.u32 %v197_v8, 16  ;;  %v240_v26 = vshrl.u32 %v203_v16, 16 }
 0x207   :  { %v233_v22 = vpack.i.b16 %v232_v15, %v231_v11  ;;  %v265_v23 = vcombine.low %v213_v13, %v229_v10  ;;  %v266_v24 = vcombine.high %v213_v13, %v229_v10 }
 0x208   :  { %v201_v20 = vpop.permute.xlu1 %200 }
 0x209   :  { %v237_v27 = vpack.i.b16 %v203_v16, %v201_v20  ;;  %v239_v28 = vshrl.u32 %v201_v20, 16  ;;  %v273_v37 = vrot.slane %v265_v23, %v5569_v17  ;;  %v280_v38 = vrot.slane %v266_v24, %v5569_v17 }
 0x20a   :  { %v399_v40 = vcombine.low %v217_v30, %v233_v22  ;;  %v400_v41 = vcombine.high %v217_v30, %v233_v22 }
 0x20b   :  { %v241_v34 = vpack.i.b16 %v240_v26, %v239_v28  ;;  %v281_v35 = vcombine.low %v221_v25, %v237_v27  ;;  %v282_v36 = vcombine.high %v221_v25, %v237_v27 }
 0x20c   :  { %v407_v50 = vrot.slane %v399_v40, %v5569_v17  ;;  %v414_v51 = vrot.slane %v400_v41, %v5569_v17 }
 0x20d   :  { %v289_v42 = vrot.slane %v281_v35, %v5569_v17  ;;  %v296_v43 = vrot.slane %v282_v36, %v5569_v17  ;;  %v415_v44 = vcombine.low %v225_v31, %v241_v34  ;;  %v416_v45 = vcombine.high %v225_v31, %v241_v34 }
 0x20f   :  { %v327_v46 = vcombine.low %v273_v37, %v289_v42  ;;  %v328_v47 = vcombine.high %v273_v37, %v289_v42  ;;  %v343_v48 = vcombine.low %v280_v38, %v296_v43  ;;  %v344_v49 = vcombine.high %v280_v38, %v296_v43 }
 0x210   :  { %v423_v52 = vrot.slane %v415_v44, %v5569_v17  ;;  %v430_v53 = vrot.slane %v416_v45, %v5569_v17 }
 0x211   :  { %v335_v54 = vrot.slane %v327_v46, %v5572_v29  ;;  %v342_v55 = vrot.slane %v328_v47, %v5572_v29  ;;  %v351_v60 = vrot.slane %v343_v48, %v5572_v29  ;;  %v358_v63 = vrot.slane %v344_v49, %v5572_v29 }
 0x212   :  { %v461_v56 = vcombine.low %v407_v50, %v423_v52  ;;  %v462_v57 = vcombine.high %v407_v50, %v423_v52  ;;  %v477_v58 = vcombine.low %v414_v51, %v430_v53  ;;  %v478_v59 = vcombine.high %v414_v51, %v430_v53 }
 0x213   :  { %v4686_v0 = vcombine.low %v335_v54, %v342_v55  ;;  %v4688_v1 = vcombine.high %v335_v54, %v342_v55  ;;  %v4694_v13 = vcombine.low %v351_v60, %v358_v63  ;;  %v4696_v14 = vcombine.high %v351_v60, %v358_v63 }
 0x214   :  { %v469_v2 = vrot.slane %v461_v56, %v5572_v29  ;;  %v476_v3 = vrot.slane %v462_v57, %v5572_v29  ;;  %v485_v4 = vrot.slane %v477_v58, %v5572_v29  ;;  %v492_v5 = vrot.slane %v478_v59, %v5572_v29 }
 0x215   :  { %v541_v6 = vrot.slane %v4686_v0, %v5569_v17  ;;  %v557_v7 = vrot.slane %v4688_v1, %v5569_v17  ;;  %v659_v23 = vrot.slane %v4694_v13, %v5569_v17  ;;  %v675_v24 = vrot.slane %v4696_v14, %v5569_v17 }
 0x216   :  { %v4698_v8 = vcombine.low %v485_v4, %v492_v5  ;;  %v4700_v10 = vcombine.high %v485_v4, %v492_v5  ;;  %v4690_v11 = vcombine.low %v469_v2, %v476_v3  ;;  %v4692_v12 = vcombine.high %v469_v2, %v476_v3 }
 0x217   :  { %v566_v15 = vcombine.high %v541_v6, %v557_v7  ;;  %v565_v27 = vcombine.low %v541_v6, %v557_v7  ;;  %v684_v35 = vcombine.high %v659_v23, %v675_v24  ;;  %v683_v55 = vcombine.low %v659_v23, %v675_v24 }
 0x218   :  { %v600_v16 = vrot.slane %v4690_v11, %v5569_v17  ;;  %v616_v18 = vrot.slane %v4692_v12, %v5569_v17  ;;  %v718_v21 = vrot.slane %v4698_v8, %v5569_v17  ;;  %v734_v22 = vrot.slane %v4700_v10, %v5569_v17 }
 0x219   :  { %v580_v19 = vrot.slane %v566_v15, %v5572_v29  ;;  %v573_v42 = vrot.slane %v565_v27, %v5572_v29  ;;  %v698_v47 = vrot.slane %v684_v35, %v5572_v29  ;;  %v691_v3 = vrot.slane %v683_v55, %v5572_v29 }
 0x21a   :  { %v625_v20 = vcombine.high %v600_v16, %v616_v18  ;;  %v624_v25 = vcombine.low %v600_v16, %v616_v18  ;;  %v743_v34 = vcombine.high %v718_v21, %v734_v22  ;;  %v742_v53 = vcombine.low %v718_v21, %v734_v22 }
 0x21b   :  { %v590_v30 = vcombine.high %v580_v19, %v5436_v9  ;;  %v784_v43 = vshrl.u32 %v580_v19, 16  ;;  %v589_v49 = vcombine.high %v573_v42, %v5436_v9  ;;  %v772_v60 = vshrl.u32 %v573_v42, 16 }
 0x21c   :  { %v639_v26 = vrot.slane %v625_v20, %v5572_v29  ;;  %v632_v38 = vrot.slane %v624_v25, %v5572_v29  ;;  %v757_v44 = vrot.slane %v743_v34, %v5572_v29  ;;  %v750_v0 = vrot.slane %v742_v53, %v5572_v29 }
 0x21d   :  { %v790_v58 = vshrl.u32 %v590_v30, 16  ;;  %v708_v1 = vcombine.high %v698_v47, %v5436_v9  ;;  %v820_v11 = vshrl.u32 %v698_v47, 16  ;;  %v778_v12 = vshrl.u32 %v589_v49, 16 }
 0x21e   :  { %v783_v28 = vpack.i.b16 %v639_v26, %v580_v19  ;;  %v649_v31 = vcombine.high %v639_v26, %v5436_v9  ;;  %v785_v40 = vshrl.u32 %v639_v26, 16  ;;  %v648_v46 = vcombine.high %v632_v38, %v5436_v9 }
 0x21f   :  { %v771_v48 = vpack.i.b16 %v632_v38, %v573_v42  ;;  %v819_v50 = vpack.i.b16 %v757_v44, %v698_v47  ;;  %v773_v57 = vshrl.u32 %v632_v38, 16  ;;  %v767_v59 = vcombine.high %v757_v44, %v5436_v9 }
 0x220   :  { %v846_v36 = vsel %vm841_vm2, %v783_v28, 0  ;;  %v789_v37 = vpack.i.b16 %v649_v31, %v590_v30  ;;  %v786_v45 = vpack.i.b16 %v785_v40, %v784_v43  ;;  %v777_v52 = vpack.i.b16 %v648_v46, %v589_v49 }
 0x221   :  { %4958 = vmatpush3.bf16.xpose.msra.mxu1 %v846_v36  ;;  %v791_v54 = vshrl.u32 %v649_v31, 16  ;;  %v1030_v56 = vsel %vm841_vm2, %v819_v50, 0  ;;  %v774_v2 = vpack.i.b16 %v773_v57, %v772_v60  ;;  %v825_v4 = vpack.i.b16 %v767_v59, %v708_v1 }
 0x222   :  { %v938_v41 = vsel %vm841_vm2, %v789_v37, 0  ;;  %4963 = vmatprep.subr.bf16.mxu1 %v5444_v62  ;;  %v892_v51 = vsel %vm841_vm2, %v786_v45, 0  ;;  %v807_v6 = vpack.i.b16 %v750_v0, %v691_v3  ;;  %v821_v7 = vshrl.u32 %v757_v44, 16 }
 0x223   :  { %4970 = vmatpush3.bf16.xpose.msra.mxu0 %v938_v41  ;;  %v792_v63 = vpack.i.b16 %v791_v54, %v790_v58  ;;  %v1122_v8 = vsel %vm841_vm2, %v825_v4, 0  ;;  %v779_v10 = vshrl.u32 %v648_v46, 16  ;;  %v766_v14 = vcombine.high %v750_v0, %v5436_v9 }
 0x224   :  { %4981 = vmatprep.subr.bf16.mxu0 %v5444_v62  ;;  %v822_v13 = vpack.i.b16 %v821_v7, %v820_v11  ;;  %v707_v16 = vcombine.high %v691_v3, %v5436_v9  ;;  %v827_v20 = vshrl.u32 %v767_v59, 16  ;;  %v809_v21 = vshrl.u32 %v750_v0, 16 }
 0x225   :  { %v984_v5 = vsel %vm841_vm2, %v792_v63, 0  ;;  %v780_v15 = vpack.i.b16 %v779_v10, %v778_v12  ;;  %v826_v22 = vshrl.u32 %v708_v1, 16  ;;  %v808_v23 = vshrl.u32 %v691_v3, 16 }
 0x226   :  { %v1076_v18 = vsel %vm841_vm2, %v822_v13, 0  ;;  %v813_v19 = vpack.i.b16 %v766_v14, %v707_v16  ;;  %v815_v27 = vshrl.u32 %v766_v14, 16  ;;  %v814_v28 = vshrl.u32 %v707_v16, 16 }
 0x227   :  { %v828_v24 = vpack.i.b16 %v827_v20, %v826_v22  ;;  %v810_v25 = vpack.i.b16 %v809_v21, %v808_v23 }
 0x228   :  { %4960 = vmatmul.mubr.msk.bf16.vlgmr.msra.gmra.mrb[0].mxu1 %vm841_vm2, %v771_v48  ;;  %v816_v30 = vpack.i.b16 %v815_v27, %v814_v28 }
 0x229   :  { %4964 = vmatpush3.bf16.xpose.msra.mxu1 %v892_v51  ;;  %4965 = vmatprep.mubr.msk.bf16.mxu1 %vm5445_vm1, %v5444_v62  ;;  %v1168_v26 = vsel %vm841_vm2, %v828_v24, 0 }
 0x22a   :  { %4972 = vmatmul.mubr.msk.bf16.vlgmr.msra.gmra.mrb[4].mxu0 %vm841_vm2, %v777_v52  ;;  %4975 = vmatprep.subr.bf16.mxu1 %v5444_v62 }
 0x22b   :  { %4982 = vmatpush3.bf16.xpose.msra.mxu0 %v1030_v56  ;;  %4983 = vmatprep.mubr.msk.bf16.mxu0 %vm5445_vm1, %v5444_v62 }
 0x22c   :  { %4993 = vmatprep.subr.bf16.mxu0 %v5444_v62 }
 0x230   :  { %4966 = vmatmul.mubr.msk.bf16.vlgmr.msra.gmra.mrb[4].mxu1 %vm841_vm2, %v774_v2 }
 0x231   :  { %4976 = vmatpush3.bf16.xpose.msra.mxu1 %v984_v5  ;;  %4977 = vmatprep.mubr.msk.bf16.mxu1 %vm5445_vm1, %v5444_v62 }
 0x232   :  { %4984 = vmatmul.mubr.msk.bf16.vlgmr.msra.gmra.mrb[8].mxu0 %vm841_vm2, %v807_v6  ;;  %4987 = vmatprep.subr.bf16.mxu1 %v5444_v62 }
 0x233   :  { %4994 = vmatpush3.bf16.xpose.msra.mxu0 %v1122_v8  ;;  %4995 = vmatprep.mubr.msk.bf16.mxu0 %vm5445_vm1, %v5444_v62 }
 0x234   :  { %5005 = vmatprep.subr.bf16.mxu0 %v5444_v62 }
 0x238   :  { %4978 = vmatmul.mubr.msk.bf16.vlgmr.msra.gmra.mrb[8].mxu1 %vm841_vm2, %v780_v15 }
 0x239   :  { %4988 = vmatpush3.bf16.xpose.msra.mxu1 %v1076_v18  ;;  %4989 = vmatprep.mubr.msk.bf16.mxu1 %vm5445_vm1, %v5444_v62 }
 0x23a   :  { %4996 = vmatmul.mubr.msk.bf16.vlgmr.msra.gmra.mrb[12].mxu0 %vm841_vm2, %v813_v19  ;;  %4999 = vmatprep.subr.bf16.mxu1 %v5444_v62 }
 0x23b   :  { %5007 = vmatprep.mubr.msk.bf16.mxu0 %vm5445_vm1, %v5444_v62 }
 0x240   :  { %4990 = vmatmul.mubr.msk.bf16.vlgmr.msra.gmra.mrb[12].mxu1 %vm841_vm2, %v810_v25 }
 0x241   :  { %5000 = vmatpush3.bf16.xpose.msra.mxu1 %v1168_v26  ;;  %5001 = vmatprep.mubr.msk.bf16.mxu1 %vm5445_vm1, %v5444_v62 }
 0x242   :  { %5011 = vmatprep.subr.bf16.mxu1 %v5444_v62 }
 0x248   :  { %5002 = vmatmul.mubr.msk.bf16.vlgmr.msra.gmra.mrb[16].mxu1 %vm841_vm2, %v816_v30 }
 0x249   :  { %5013 = vmatprep.mubr.msk.bf16.mxu1 %vm5445_vm1, %v5444_v62 }
 0x2fb   :  { %v882_v31 = vpop.f32.mrb[0].mxu1 }
 0x2fc   :  { %v1210_v34 = vmul.f32 0.25, %v882_v31  ;;  %v4961_v35 = vpop.f32.mrb[1].mxu1 }
 0x2fd   :  { %v885_v36 = vpop.f32.mrb[2].mxu1  ;;  %v974_v37 = vpop.f32.mrb[4].mxu0 }
 0x2fe   :  { %v4962_v38 = vpop.f32.mrb[3].mxu1  ;;  %v4973_v40 = vpop.f32.mrb[5].mxu0  ;;  %v1219_v41 = vsel %vm1218_vm3, %v1210_v34, -inf  ;;  %v1212_v49 = vmul.f32 0.25, %v974_v37 }
 0x2ff   :  { %1220 = vmax.xlane.f32.xlu1 %v1219_v41  ;;  %v977_v42 = vpop.f32.mrb[6].mxu0 }
 0x300   :  { %v4974_v43 = vpop.f32.mrb[7].mxu0  ;;  %v1225_v57 = vsel %vm1218_vm3, %v1212_v49, -inf }
 0x303   :  { %v928_v44 = vpop.f32.mrb[4].mxu1 }
 0x304   :  { %v1211_v45 = vmul.f32 0.25, %v928_v44  ;;  %v4967_v46 = vpop.f32.mrb[5].mxu1 }
 0x305   :  { %v931_v47 = vpop.f32.mrb[6].mxu1  ;;  %v1066_v48 = vpop.f32.mrb[8].mxu0 }
 0x306   :  { %v5655_v50 = vmul.f32 0.25, %v1066_v48  ;;  %v4968_v51 = vpop.f32.mrb[7].mxu1  ;;  %v4985_v52 = vpop.f32.mrb[9].mxu0  ;;  %v1222_v53 = vsel %vm1218_vm3, %v1211_v45, -inf }
 0x307   :  { %1223 = vmax.xlane.f32.xlu0 %v1222_v53  ;;  %v1069_v54 = vpop.f32.mrb[10].mxu0 }
 0x308   :  { %v4986_v55 = vpop.f32.mrb[11].mxu0  ;;  %v1231_v56 = vsel %vm1218_vm3, %v5655_v50, -inf }
 0x309   :  { %1232 = vmax.xlane.f32.xlu1 %v1231_v56 }
 0x30b   :  { %v1020_v58 = vpop.f32.mrb[8].mxu1  ;;  %1226 = vmax.xlane.f32.xlu0 %v1225_v57 }
 0x30c   :  { %v1213_v59 = vmul.f32 0.25, %v1020_v58  ;;  %v4979_v60 = vpop.f32.mrb[9].mxu1 }
 0x30d   :  { %v1023_v63 = vpop.f32.mrb[10].mxu1  ;;  %v1158_v0 = vpop.f32.mrb[12].mxu0 }
 0x30e   :  { %v5661_v1 = vmul.f32 0.25, %v1158_v0  ;;  %v4980_v2 = vpop.f32.mrb[11].mxu1  ;;  %v4997_v3 = vpop.f32.mrb[13].mxu0  ;;  %v1228_v4 = vsel %vm1218_vm3, %v1213_v59, -inf }
 0x30f   :  { %1229 = vmax.xlane.f32.xlu0 %v1228_v4  ;;  %v1161_v5 = vpop.f32.mrb[14].mxu0 }
 0x310   :  { %v4998_v6 = vpop.f32.mrb[15].mxu0  ;;  %v1237_v7 = vsel %vm1218_vm3, %v5661_v1, -inf }
 0x311   :  { %1238 = vmax.xlane.f32.xlu1 %v1237_v7 }
 0x313   :  { %v1112_v8 = vpop.f32.mrb[12].mxu1 }
 0x314   :  { %v1215_v10 = vmul.f32 0.25, %v1112_v8  ;;  %v4991_v11 = vpop.f32.mrb[13].mxu1 }
 0x315   :  { %v1115_v12 = vpop.f32.mrb[14].mxu1  ;;  %v247_v11 = vshrl.u32 %v5553_v61, 16 }
 0x316   :  { %v4992_v13 = vpop.f32.mrb[15].mxu1  ;;  %v1234_v14 = vsel %vm1218_vm3, %v1215_v10, -inf }
 0x317   :  { %1235 = vmax.xlane.f32.xlu0 %v1234_v14 }
 0x31b   :  { %v1204_v15 = vpop.f32.mrb[16].mxu1 }
 0x31c   :  { %v1217_v16 = vmul.f32 0.25, %v1204_v15  ;;  %v5003_v18 = vpop.f32.mrb[17].mxu1 }
 0x31d   :  { %v1207_v19 = vpop.f32.mrb[18].mxu1 }
 0x31e   :  { %v5004_v20 = vpop.f32.mrb[19].mxu1  ;;  %v1240_v21 = vsel %vm1218_vm3, %v1217_v16, -inf }
 0x31f   :  { %1241 = vmax.xlane.f32.xlu0 %v1240_v21 }
 0x322   :  { %205 = vrot.lane.b32.xlu1 %v5553_v61, %s5438_s13 }
 0x38c   :  { %v1221_v22 = vpop.xlane.xlu1 %1220 }
 0x38d   :  { %v1243_v23 = vsub.f32 %v1210_v34, %v1221_v22 }
 0x38f   :  { %v1251_v24 = vmul.f32 1.442695, %v1243_v23 }
 0x391   :  { %5354 = vpow2.f32 %v1251_v24 }
 0x394   :  { %v1224_v25 = vpop.xlane.xlu0 %1223 }
 0x395   :  { %v1244_v26 = vsub.f32 %v1211_v45, %v1224_v25 }
 0x396   :  { %v1233_v46 = vpop.xlane.xlu1 %1232 }
 0x397   :  { %v1253_v27 = vmul.f32 1.442695, %v1244_v26  ;;  %v1247_v48 = vsub.f32 %v5655_v50, %v1233_v46 }
 0x398   :  { %v1227_v34 = vpop.xlane.xlu0 %1226 }
 0x399   :  { %5356 = vpow2.f32 %v1253_v27  ;;  %v1245_v37 = vsub.f32 %v1212_v49, %v1227_v34  ;;  %v1259_v53 = vmul.f32 1.442695, %v1247_v48 }
 0x39b   :  { %v5670_v28 = vpop.eup %5354  ;;  %v1255_v40 = vmul.f32 1.442695, %v1245_v37 }
 0x39c   :  { %v1267_v30 = vsel %vm1218_vm3, %v5670_v28, 0.0  ;;  %v1230_v36 = vpop.xlane.xlu0 %1229 }
 0x39d   :  { %1268 = vadd.xlane.f32.xlu1 %v1267_v30  ;;  %v1246_v43 = vsub.f32 %v1213_v59, %v1230_v36  ;;  %5358 = vpow2.f32 %v1255_v40 }
 0x39e   :  { %v1239_v52 = vpop.xlane.xlu1 %1238 }
 0x39f   :  { %v1257_v47 = vmul.f32 1.442695, %v1246_v43  ;;  %v1249_v54 = vsub.f32 %v5661_v1, %v1239_v52 }
 0x3a1   :  { %v1263_v55 = vmul.f32 1.442695, %v1249_v54 }
 0x3a2   :  { %v206_v4 = vpop.permute.xlu1 %205 }
 0x3a3   :  { %v5674_v31 = vpop.eup %5356  ;;  %v248_v7 = vshrl.u32 %v206_v4, 16 }
 0x3a4   :  { %v1270_v35 = vsel %vm1218_vm3, %v5674_v31, 0.0  ;;  %v1236_v38 = vpop.xlane.xlu0 %1235 }
 0x3a5   :  { %1271 = vadd.xlane.f32.xlu0 %v1270_v35  ;;  %v1248_v41 = vsub.f32 %v1215_v10, %v1236_v38  ;;  %v5709_v10 = vpack.i.b16 %v206_v4, %v5553_v61 }
 0x3a7   :  { %v1261_v44 = vmul.f32 1.442695, %v1248_v41  ;;  %v5684_v49 = vpop.eup %5358  ;;  %v304_v18 = vrot.slane %v5709_v10, %v5569_v17 }
 0x3a8   :  { %v1273_v56 = vsel %vm1218_vm3, %v5684_v49, 0.0 }
 0x3a9   :  { %5360 = vpow2.f32 %v1261_v44 }
 0x3aa   :  { %5362 = vpow2.f32 %v1257_v47 }
 0x3ac   :  { %v1242_v42 = vpop.xlane.xlu0 %1241 }
 0x3ad   :  { %v1250_v45 = vsub.f32 %v1217_v16, %v1242_v42  ;;  %v249_v16 = vpack.i.b16 %v248_v7, %v247_v11 }
 0x3ae   :  { %209 = vrot.lane.b32.xlu1 %v5553_v61, %s5439_s14 }
 0x3af   :  { %v1265_v51 = vmul.f32 1.442695, %v1250_v45  ;;  %v438_v23 = vrot.slane %v249_v16, %v5569_v17 }
 0x3b1   :  { %5364 = vpow2.f32 %v1265_v51 }
 0x3b2   :  { %5366 = vpow2.f32 %v1259_v53  ;;  %v5733_v53 = vpack.i.b16 %v5436_v9, %v5436_v9 }
 0x3b3   :  { %v5688_v57 = vpop.eup %5360  ;;  %5368 = vpow2.f32 %v1263_v55 }
 0x3b4   :  { %v5690_v50 = vpop.eup %5362  ;;  %v1282_v58 = vsel %vm1218_vm3, %v5688_v57, 0.0 }
 0x3b5   :  { %v1276_v60 = vsel %vm1218_vm3, %v5690_v50, 0.0 }
 0x3bb   :  { %207 = vrot.lane.b32.xlu0 %v5553_v61, %s5437_s12  ;;  %v5694_v59 = vpop.eup %5364 }
 0x3bc   :  { %v1288_v63 = vsel %vm1218_vm3, %v5694_v59, 0.0  ;;  %v5700_v0 = vpop.eup %5366 }
 0x3bd   :  { %v1279_v1 = vsel %vm1218_vm3, %v5700_v0, 0.0  ;;  %v5704_v2 = vpop.eup %5368 }
 0x3be   :  { %v1285_v3 = vsel %vm1218_vm3, %v5704_v2, 0.0 }
 0x3d2   :  { %1274 = vadd.xlane.f32.xlu1 %v1273_v56 }
 0x3d6   :  { %1283 = vadd.xlane.f32.xlu1 %v1282_v58 }
 0x3da   :  { %1277 = vadd.xlane.f32.xlu0 %v1276_v60  ;;  %1289 = vadd.xlane.f32.xlu1 %v1288_v63 }
 0x3de   :  { %1280 = vadd.xlane.f32.xlu0 %v1279_v1 }
 0x3e2   :  { %1286 = vadd.xlane.f32.xlu0 %v1285_v3 }
 0x42a   :  { %v1269_v5 = vpop.xlane.xlu1 %1268 }
 0x42b   :  { %5370 = vrcp.f32 %v1269_v5 }
 0x42e   :  { %v210_v8 = vpop.permute.xlu1 %209 }
 0x42f   :  { %v256_v13 = vshrl.u32 %v210_v8, 16 }
 0x432   :  { %v1272_v6 = vpop.xlane.xlu0 %1271 }
 0x433   :  { %5372 = vrcp.f32 %v1272_v6 }
 0x435   :  { %v5371_v46 = vpop.eup %5370 }
 0x436   :  { %v208_v12 = vpop.permute.xlu0 %207  ;;  %v1299_v54 = vmul.f32 %v5371_v46, %v5670_v28 }
 0x437   :  { %v5712_v14 = vpack.i.b16 %v210_v8, %v208_v12  ;;  %v255_v15 = vshrl.u32 %v208_v12, 16  ;;  %v431_v8 = vcombine.high %v249_v16, %v5733_v53 }
 0x438   :  { %v1307_v12 = vpack.c.bf16 %v1299_v54, %v1299_v54 }
 0x439   :  { %v257_v19 = vpack.i.b16 %v256_v13, %v255_v15  ;;  %v319_v20 = vrot.slane %v5712_v14, %v5569_v17  ;;  %v312_v28 = vcombine.high %v5712_v14, %v5733_v53  ;;  %v297_v13 = vcombine.high %v5709_v10, %v5733_v53 }
 0x43a   :  { %v445_v14 = vrot.slane %v431_v8, %v5569_v17 }
 0x43b   :  { %v359_v21 = vcombine.low %v304_v18, %v319_v20  ;;  %v360_v22 = vcombine.high %v304_v18, %v319_v20  ;;  %v453_v61 = vrot.slane %v257_v19, %v5569_v17  ;;  %v446_v1 = vcombine.high %v257_v19, %v5733_v53 }
 0x43c   :  { %v326_v19 = vrot.slane %v312_v28, %v5569_v17  ;;  %v311_v20 = vrot.slane %v297_v13, %v5569_v17 }
 0x43d   :  { %v367_v24 = vrot.slane %v359_v21, %v5572_v29  ;;  %v374_v25 = vrot.slane %v360_v22, %v5572_v29  ;;  %v493_v26 = vcombine.low %v438_v23, %v453_v61  ;;  %v494_v27 = vcombine.high %v438_v23, %v453_v61  ;;  %v5373_v51 = vpop.eup %5372 }
 0x43e   :  { %v1300_v63 = vmul.f32 %v5373_v51, %v5674_v31  ;;  %v460_v15 = vrot.slane %v446_v1, %v5569_v17  ;;  %v375_v23 = vcombine.low %v311_v20, %v326_v19  ;;  %v376_v61 = vcombine.high %v311_v20, %v326_v19 }
 0x43f   :  { %v4687_v30 = vcombine.low %v367_v24, %v374_v25  ;;  %v4689_v35 = vcombine.high %v367_v24, %v374_v25  ;;  %v501_v34 = vrot.slane %v493_v26, %v5572_v29  ;;  %v508_v36 = vrot.slane %v494_v27, %v5572_v29 }
 0x440   :  { %v1308_v18 = vpack.c.bf16 %v1300_v63, %v1300_v63  ;;  %v509_v21 = vcombine.low %v445_v14, %v460_v15  ;;  %v510_v22 = vcombine.high %v445_v14, %v460_v15  ;;  %v383_v26 = vrot.slane %v375_v23, %v5572_v29 }
 0x441   :  { %v548_v37 = vrot.slane %v4687_v30, %v5569_v17  ;;  %v564_v38 = vrot.slane %v4689_v35, %v5569_v17  ;;  %v4691_v40 = vcombine.low %v501_v34, %v508_v36  ;;  %v4693_v41 = vcombine.high %v501_v34, %v508_v36 }
 0x442   :  { %v517_v24 = vrot.slane %v509_v21, %v5572_v29  ;;  %v524_v25 = vrot.slane %v510_v22, %v5572_v29  ;;  %v390_v27 = vrot.slane %v376_v61, %v5572_v29  ;;  %v5310_v61 = vld [vmem:[%s6381_s4] sm:$0xff]  }
 0x443   :  { %v581_v42 = vcombine.low %v548_v37, %v564_v38  ;;  %v607_v43 = vrot.slane %v4691_v40, %v5569_v17  ;;  %v623_v44 = vrot.slane %v4693_v41, %v5569_v17 }
 0x444   :  { %v4699_v30 = vcombine.low %v517_v24, %v524_v25  ;;  %v4701_v35 = vcombine.high %v517_v24, %v524_v25  ;;  %v4695_v34 = vcombine.low %v383_v26, %v390_v27  ;;  %v4697_v36 = vcombine.high %v383_v26, %v390_v27  ;;  %v5312_v25 = vld [vmem:[%s6381_s4 + $0x10] sm:$0xff]  }
 0x445   :  { %v588_v45 = vrot.slane %v581_v42, %v5572_v29  ;;  %v640_v47 = vcombine.low %v607_v43, %v623_v44 }
 0x446   :  { %v725_v38 = vrot.slane %v4699_v30, %v5569_v17  ;;  %v741_v40 = vrot.slane %v4701_v35, %v5569_v17  ;;  %v666_v41 = vrot.slane %v4695_v34, %v5569_v17  ;;  %v682_v42 = vrot.slane %v4697_v36, %v5569_v17  ;;  %v5313_v34 = vld [vmem:[%s6381_s4 + $0x18] sm:$0xff]  }
 0x447   :  { %v591_v48 = vcombine.high %v588_v45, %v5436_v9  ;;  %v647_v52 = vrot.slane %v640_v47, %v5572_v29  ;;  %v796_v56 = vshrl.u32 %v588_v45, 16 }
 0x448   :  { %v758_v43 = vcombine.low %v725_v38, %v741_v40  ;;  %v699_v44 = vcombine.low %v666_v41, %v682_v42 }
 0x449   :  { %v795_v55 = vpack.i.b16 %v647_v52, %v588_v45  ;;  %v797_v58 = vshrl.u32 %v647_v52, 16  ;;  %v650_v60 = vcombine.high %v647_v52, %v5436_v9  ;;  %v802_v3 = vshrl.u32 %v591_v48, 16 }
 0x44a   :  { %v765_v46 = vrot.slane %v758_v43, %v5572_v29  ;;  %v5314_v43 = vld [vmem:[%s6381_s4 + $0x20] sm:$0xff]  }
 0x44b   :  { %v1320_v4 = vsel %vm1318_vm4, %v795_v55, 0  ;;  %v798_v5 = vpack.i.b16 %v797_v58, %v796_v56  ;;  %v801_v6 = vpack.i.b16 %v650_v60, %v591_v48  ;;  %v803_v7 = vshrl.u32 %v650_v60, 16 }
 0x44c   :  { %5006 = vmatpush3.bf16.msra.mxu0 %v1320_v4  ;;  %v706_v48 = vrot.slane %v699_v44, %v5572_v29  ;;  %v833_v63 = vshrl.u32 %v765_v46, 16 }
 0x44d   :  { %v1366_v11 = vsel %vm1318_vm4, %v798_v5, 0  ;;  %5017 = vmatprep.subr.bf16.mxu0 %v5444_v62  ;;  %v804_v31 = vpack.i.b16 %v803_v7, %v802_v3  ;;  %v1412_v16 = vsel %vm1318_vm4, %v801_v6, 0  ;;  %v768_v6 = vcombine.high %v765_v46, %v5436_v9 }
 0x44e   :  { %5012 = vmatpush3.bf16.msra.mxu1 %v1366_v11  ;;  %v831_v55 = vpack.i.b16 %v765_v46, %v706_v48  ;;  %v832_v3 = vshrl.u32 %v706_v48, 16  ;;  %v709_v28 = vcombine.high %v706_v48, %v5436_v9 }
 0x44f   :  { %5008 = vmatmul.mubr.msk.bf16.vlgmr.msra.gmra.mrb[16].mxu0 %vm1218_vm3, %v1307_v12  ;;  %5023 = vmatprep.subr.bf16.mxu1 %v5444_v62  ;;  %v1458_v10 = vsel %vm1318_vm4, %v804_v31, 0  ;;  %v839_v15 = vshrl.u32 %v768_v6, 16 }
 0x450   :  { %5018 = vmatpush3.bf16.msra.mxu0 %v1412_v16  ;;  %5019 = vmatprep.mubr.msk.bf16.mxu0 %vm5445_vm1, %v5444_v62  ;;  %v1504_v60 = vsel %vm1318_vm4, %v831_v55, 0  ;;  %v834_v5 = vpack.i.b16 %v833_v63, %v832_v3  ;;  %v837_v13 = vpack.i.b16 %v768_v6, %v709_v28 }
 0x451   :  { %5014 = vmatmul.mubr.msk.bf16.vlgmr.msra.gmra.mrb[20].mxu1 %vm1218_vm3, %v1308_v18  ;;  %5029 = vmatprep.subr.bf16.mxu0 %v5444_v62  ;;  %v838_v18 = vshrl.u32 %v709_v28, 16 }
 0x452   :  { %5024 = vmatpush3.bf16.msra.mxu1 %v1458_v10  ;;  %5025 = vmatprep.mubr.msk.bf16.mxu1 %vm5445_vm1, %v5444_v62  ;;  %v1550_v31 = vsel %vm1318_vm4, %v834_v5, 0  ;;  %v5317_v5 = vld [vmem:[%s6381_s4 + $0x38] sm:$0xff]  }
 0x453   :  { %5035 = vmatprep.subr.bf16.mxu1 %v5444_v62  ;;  %v840_v19 = vpack.i.b16 %v839_v15, %v838_v18 }
 0x455   :  { %v1642_v21 = vsel %vm1318_vm4, %v840_v19, 0 }
 0x45f   :  { %v1275_v37 = vpop.xlane.xlu1 %1274 }
 0x460   :  { %5374 = vrcp.f32 %v1275_v37 }
 0x463   :  { %v1284_v47 = vpop.xlane.xlu1 %1283 }
 0x467   :  { %v1278_v45 = vpop.xlane.xlu0 %1277  ;;  %v1290_v1 = vpop.xlane.xlu1 %1289 }
 0x468   :  { %5376 = vrcp.f32 %v1278_v45 }
 0x469   :  { %5378 = vrcp.f32 %v1284_v47 }
 0x46a   :  { %v5375_v51 = vpop.eup %5374 }
 0x46b   :  { %v1301_v52 = vmul.f32 %v5375_v51, %v5684_v49  ;;  %v1281_v54 = vpop.xlane.xlu0 %1280  ;;  %v5315_v51 = vld [vmem:[%s6381_s4 + $0x28] sm:$0xff]  }
 0x46c   :  { %5380 = vrcp.f32 %v1281_v54 }
 0x46d   :  { %v1309_v56 = vpack.c.bf16 %v1301_v52, %v1301_v52 }
 0x46f   :  { %v1287_v58 = vpop.xlane.xlu0 %1286  ;;  %5020 = vmatmul.mubr.msk.bf16.vlgmr.msra.gmra.mrb[20].mxu0 %vm1218_vm3, %v1309_v56 }
 0x470   :  { %5382 = vrcp.f32 %v1287_v58  ;;  %5030 = vmatpush3.bf16.msra.mxu0 %v1504_v60  ;;  %5031 = vmatprep.mubr.msk.bf16.mxu0 %vm5445_vm1, %v5444_v62  ;;  %v5316_v60 = vld [vmem:[%s6381_s4 + $0x30] sm:$0xff]  }
 0x471   :  { %5041 = vmatprep.subr.bf16.mxu0 %v5444_v62  ;;  %5384 = vrcp.f32 %v1290_v1 }
 0x472   :  { %v5377_v49 = vpop.eup %5376 }
 0x473   :  { %v1302_v4 = vmul.f32 %v5377_v49, %v5690_v50  ;;  %v5379_v7 = vpop.eup %5378 }
 0x474   :  { %v1304_v50 = vmul.f32 %v5379_v7, %v5688_v57 }
 0x475   :  { %v1310_v8 = vpack.c.bf16 %v1302_v4, %v1302_v4 }
 0x476   :  { %v5381_v11 = vpop.eup %5380  ;;  %v1312_v20 = vpack.c.bf16 %v1304_v50, %v1304_v50 }
 0x477   :  { %v1303_v12 = vmul.f32 %v5381_v11, %v5700_v0  ;;  %5026 = vmatmul.mubr.msk.bf16.vlgmr.msra.gmra.mrb[24].mxu1 %vm1218_vm3, %v1310_v8  ;;  %v1596_v0 = vsel %vm1318_vm4, %v837_v13, 0 }
 0x478   :  { %5036 = vmatpush3.bf16.msra.mxu1 %v1550_v31  ;;  %5037 = vmatprep.mubr.msk.bf16.mxu1 %vm5445_vm1, %v5444_v62 }
 0x479   :  { %v1311_v16 = vpack.c.bf16 %v1303_v12, %v1303_v12  ;;  %5047 = vmatprep.subr.bf16.mxu1 %v5444_v62 }
 0x47a   :  { %v5383_v14 = vpop.eup %5382 }
 0x47b   :  { %5032 = vmatmul.mubr.msk.bf16.vlgmr.msra.gmra.mrb[24].mxu0 %vm1218_vm3, %v1311_v16  ;;  %v1305_v10 = vmul.f32 %v5383_v14, %v5704_v2  ;;  %v5385_v57 = vpop.eup %5384 }
 0x47c   :  { %5042 = vmatpush3.bf16.msra.mxu0 %v1596_v0  ;;  %5043 = vmatprep.mubr.msk.bf16.mxu0 %vm5445_vm1, %v5444_v62  ;;  %v1306_v22 = vmul.f32 %v5385_v57, %v5694_v59  ;;  %v5311_v59 = vld [vmem:[%s6381_s4 + $0x8] sm:$0xff]  }
 0x47d   :  { %5053 = vmatprep.subr.bf16.mxu0 %v5444_v62  ;;  %v1313_v23 = vpack.c.bf16 %v1305_v10, %v1305_v10 }
 0x47e   :  { %v1314_v2 = vpack.c.bf16 %v1306_v22, %v1306_v22 }
 0x47f   :  { %5038 = vmatmul.mubr.msk.bf16.vlgmr.msra.gmra.mrb[28].mxu1 %vm1218_vm3, %v1312_v20 }
 0x480   :  { %5048 = vmatpush3.bf16.msra.mxu1 %v1642_v21  ;;  %5049 = vmatprep.mubr.msk.bf16.mxu1 %vm5445_vm1, %v5444_v62 }
 0x481   :  { %5059 = vmatprep.subr.bf16.mxu1 %v5444_v62 }
 0x483   :  { %5044 = vmatmul.mubr.msk.bf16.vlgmr.msra.gmra.mrb[28].mxu0 %vm1218_vm3, %v1313_v23 }
 0x484   :  { %5055 = vmatprep.mubr.msk.bf16.mxu0 %vm5445_vm1, %v5444_v62  ;;  %5054 = vmatpush3.bf16.msra.mxu0 %v5310_v61 }
 0x485   :  { %5065 = vmatprep.subr.bf16.mxu0 %v5444_v62 }
 0x487   :  { %5050 = vmatmul.mubr.msk.bf16.vlgmr.msra.gmra.mrb[32].mxu1 %vm1218_vm3, %v1314_v2 }
 0x488   :  { %5061 = vmatprep.mubr.msk.bf16.mxu1 %vm5445_vm1, %v5444_v62  ;;  %5060 = vmatpush3.bf16.msra.mxu1 %v5311_v59 }
 0x489   :  { %5071 = vmatprep.subr.bf16.mxu1 %v5444_v62 }
 0x522   :  { %v1356_v24 = vpop.f32.mrb[16].mxu0 }
 0x523   :  { %v1684_v26 = vpack.c.bf16 %v1356_v24, %v1356_v24  ;;  %v5009_v27 = vpop.f32.mrb[17].mxu0 }
 0x524   :  { %v1359_v30 = vpop.f32.mrb[18].mxu0  ;;  %v1402_v35 = vpop.f32.mrb[20].mxu1 }
 0x525   :  { %v1685_v36 = vpack.c.bf16 %v1402_v35, %v1402_v35  ;;  %v5010_v37 = vpop.f32.mrb[19].mxu0  ;;  %v5015_v38 = vpop.f32.mrb[21].mxu1  ;;  %5056 = vmatmul.mubr.msk.bf16.vlgmr.msra.gmra.mrb[32].mxu0 %vm841_vm2, %v1684_v26 }
 0x526   :  { %v1405_v40 = vpop.f32.mrb[22].mxu1  ;;  %5066 = vmatpush3.bf16.msra.mxu0 %v5312_v25  ;;  %5067 = vmatprep.mubr.msk.bf16.mxu0 %vm5445_vm1, %v5444_v62  ;;  %v5869_v38 = vld [vmem:[%s6379_s1] sm:$0xff] }
 0x527   :  { %v5016_v41 = vpop.f32.mrb[23].mxu1  ;;  %5062 = vmatmul.mubr.msk.bf16.vlgmr.msra.gmra.mrb[36].mxu1 %vm841_vm2, %v1685_v36  ;;  %5077 = vmatprep.subr.bf16.mxu0 %v5444_v62  ;;  %v2116_v36 = vsub.s32 4, %v5534_v32 }
 0x528   :  { %5072 = vmatpush3.bf16.msra.mxu1 %v5313_v34  ;;  %5073 = vmatprep.mubr.msk.bf16.mxu1 %vm5445_vm1, %v5444_v62 }
 0x529   :  { %5083 = vmatprep.subr.bf16.mxu1 %v5444_v62  ;;  %v2117_v40 = vrot.slane %v5869_v38, %v2116_v36 }
 0x542   :  { %v1448_v42 = vpop.f32.mrb[20].mxu0 }
 0x543   :  { %v1686_v44 = vpack.c.bf16 %v1448_v42, %v1448_v42  ;;  %v5021_v45 = vpop.f32.mrb[21].mxu0 }
 0x544   :  { %v1451_v46 = vpop.f32.mrb[22].mxu0 }
 0x545   :  { %v5022_v47 = vpop.f32.mrb[23].mxu0  ;;  %5068 = vmatmul.mubr.msk.bf16.vlgmr.msra.gmra.mrb[36].mxu0 %vm841_vm2, %v1686_v44 }
 0x546   :  { %5078 = vmatpush3.bf16.msra.mxu0 %v5314_v43  ;;  %5079 = vmatprep.mubr.msk.bf16.mxu0 %vm5445_vm1, %v5444_v62 }
 0x547   :  { %5089 = vmatprep.subr.bf16.mxu0 %v5444_v62 }
 0x54a   :  { %v1494_v48 = vpop.f32.mrb[24].mxu1 }
 0x54b   :  { %v1687_v52 = vpack.c.bf16 %v1494_v48, %v1494_v48  ;;  %v5027_v54 = vpop.f32.mrb[25].mxu1 }
 0x54c   :  { %v1497_v55 = vpop.f32.mrb[26].mxu1 }
 0x54d   :  { %v5028_v56 = vpop.f32.mrb[27].mxu1  ;;  %5074 = vmatmul.mubr.msk.bf16.vlgmr.msra.gmra.mrb[40].mxu1 %vm841_vm2, %v1687_v52 }
 0x54e   :  { %v1540_v58 = vpop.f32.mrb[24].mxu0  ;;  %5084 = vmatpush3.bf16.msra.mxu1 %v5315_v51  ;;  %5085 = vmatprep.mubr.msk.bf16.mxu1 %vm5445_vm1, %v5444_v62  ;;  %v5433_v51 = vld [vmem:[%s6377_s0] sm:$0xff] }
 0x54f   :  { %v1688_v63 = vpack.c.bf16 %v1540_v58, %v1540_v58  ;;  %v5033_v1 = vpop.f32.mrb[25].mxu0  ;;  %5095 = vmatprep.subr.bf16.mxu1 %v5444_v62 }
 0x550   :  { %v1543_v3 = vpop.f32.mrb[26].mxu0 }
 0x551   :  { %v5034_v49 = vpop.f32.mrb[27].mxu0  ;;  %5080 = vmatmul.mubr.msk.bf16.vlgmr.msra.gmra.mrb[40].mxu0 %vm841_vm2, %v1688_v63 }
 0x552   :  { %v1586_v4 = vpop.f32.mrb[28].mxu1  ;;  %5090 = vmatpush3.bf16.msra.mxu0 %v5316_v60  ;;  %5091 = vmatprep.mubr.msk.bf16.mxu0 %vm5445_vm1, %v5444_v62 }
 0x553   :  { %v1689_v6 = vpack.c.bf16 %v1586_v4, %v1586_v4  ;;  %v5039_v7 = vpop.f32.mrb[29].mxu1  ;;  %5101 = vmatprep.subr.bf16.mxu0 %v5444_v62 }
 0x554   :  { %v1589_v8 = vpop.f32.mrb[30].mxu1 }
 0x555   :  { %v5040_v28 = vpop.f32.mrb[31].mxu1  ;;  %5086 = vmatmul.mubr.msk.bf16.vlgmr.msra.gmra.mrb[44].mxu1 %vm841_vm2, %v1689_v6 }
 0x556   :  { %v1632_v11 = vpop.f32.mrb[28].mxu0  ;;  %5096 = vmatpush3.bf16.msra.mxu1 %v5317_v5  ;;  %5097 = vmatprep.mubr.msk.bf16.mxu1 %vm5445_vm1, %v5444_v62 }
 0x557   :  { %v1690_v12 = vpack.c.bf16 %v1632_v11, %v1632_v11  ;;  %v5045_v31 = vpop.f32.mrb[29].mxu0  ;;  %5113 = vmatprep.subr.bf16.mxu1 %v5444_v62 }
 0x558   :  { %v1635_v13 = vpop.f32.mrb[30].mxu0 }
 0x559   :  { %v5046_v15 = vpop.f32.mrb[31].mxu0  ;;  %5092 = vmatmul.mubr.msk.bf16.vlgmr.msra.gmra.mrb[44].mxu0 %vm841_vm2, %v1690_v12 }
 0x55a   :  { %v1678_v50 = vpop.f32.mrb[32].mxu1  ;;  %5109 = vmatprep.mubr.msk.bf16.mxu0 %vm5445_vm1, %v5444_v62 }
 0x55b   :  { %v1691_v16 = vpack.c.bf16 %v1678_v50, %v1678_v50  ;;  %v5051_v18 = vpop.f32.mrb[33].mxu1 }
 0x55c   :  { %v1681_v14 = vpop.f32.mrb[34].mxu1 }
 0x55d   :  { %v5052_v0 = vpop.f32.mrb[35].mxu1  ;;  %5098 = vmatmul.mubr.msk.bf16.vlgmr.msra.gmra.mrb[48].mxu1 %vm841_vm2, %v1691_v16 }
 0x55e   :  { %5117 = vmatprep.mubr.msk.bf16.mxu1 %vm5445_vm1, %v5444_v62 }
 0x5f8   :  { %v1751_v19 = vpop.f32.mrb[32].mxu0 }
 0x5f9   :  { %v5057_v10 = vpop.f32.mrb[33].mxu0  ;;  %v2100_v21 = vsel %vm36_vm0, %v1751_v19, 0.0  ;;  %v5434_v19 = vld [vmem:[%s6377_s0 + $0x8] sm:$0xff] }
 0x5fa   :  { %v1754_v20 = vpop.f32.mrb[34].mxu0  ;;  %v1800_v57 = vpop.f32.mrb[36].mxu1 }
 0x5fb   :  { %v2101_v22 = vsel %vm36_vm0, %v1800_v57, 0.0  ;;  %v5058_v23 = vpop.f32.mrb[35].mxu0  ;;  %v5063_v2 = vpop.f32.mrb[37].mxu1 }
 0x5fc   :  { %v2102_v61 = vadd.f32 %v2101_v22, %v2100_v21  ;;  %v1803_v59 = vpop.f32.mrb[38].mxu1  ;;  %v5318_v22 = vld [vmem:[%s6382_s5] sm:$0xff]   ;;  %v5319_v23 = vld [vmem:[%s6382_s5 + $0x8] sm:$0xff]   ;;  %v5320_v2 = vld [vmem:[%s6382_s5 + $0x10] sm:$0xff]  }
 0x5fd   :  { %v5064_v24 = vpop.f32.mrb[39].mxu1  ;;  %5102 = vmatpush3.bf16.msra.mxu0 %v5318_v22 }
 0x5fe   :  { %5103 = vmatprep.subr.bf16.mxu0 %v5444_v62 }
 0x601   :  { %5104 = vmatpush3.bf16.msra.mxu0 %v5319_v23 }
 0x602   :  { %5105 = vmatprep.subr.bf16.mxu0 %v5444_v62 }
 0x605   :  { %5106 = vmatpush3.bf16.msra.mxu0 %v5320_v2 }
 0x606   :  { %5107 = vmatprep.subr.bf16.mxu0 %v5444_v62 }
 0x618   :  { %v1849_v25 = vpop.f32.mrb[36].mxu0 }
 0x619   :  { %v2103_v26 = vsel %vm36_vm0, %v1849_v25, 0.0  ;;  %v5069_v27 = vpop.f32.mrb[37].mxu0 }
 0x61a   :  { %v2104_v30 = vadd.f32 %v2103_v26, %v2102_v61  ;;  %v1852_v35 = vpop.f32.mrb[38].mxu0  ;;  %v5321_v61 = vld [vmem:[%s6382_s5 + $0x18] sm:$0xff]  }
 0x61b   :  { %v5070_v34 = vpop.f32.mrb[39].mxu0  ;;  %5108 = vmatpush3.bf16.msra.mxu0 %v5321_v61 }
 0x61c   :  { %5121 = vmatprep.subr.bf16.mxu0 %v5444_v62 }
 0x620   :  { %v1898_v37 = vpop.f32.mrb[40].mxu1 }
 0x621   :  { %v2105_v41 = vsel %vm36_vm0, %v1898_v37, 0.0  ;;  %v5075_v42 = vpop.f32.mrb[41].mxu1 }
 0x622   :  { %v2106_v43 = vadd.f32 %v2105_v41, %v2104_v30  ;;  %v1901_v44 = vpop.f32.mrb[42].mxu1 }
 0x623   :  { %v5076_v45 = vpop.f32.mrb[43].mxu1 }
 0x624   :  { %v2118_v46 = vadd.f32 %v2117_v40, %v2106_v43  ;;  %v1947_v47 = vpop.f32.mrb[40].mxu0  ;;  %v5916_v45 = vsub.s32 2, %v5534_v32 }
 0x625   :  { %v5081_v48 = vpop.f32.mrb[41].mxu0  ;;  %v2107_v63 = vsel %vm36_vm0, %v1947_v47, 0.0 }
 0x626   :  { %v5878_v52 = vadd.f32 %v5433_v51, %v2118_v46  ;;  %v1950_v54 = vpop.f32.mrb[42].mxu0  ;;  %v2155_v51 = vrot.slane %v5869_v38, %v5916_v45 }
 0x627   :  { %v5082_v55 = vpop.f32.mrb[43].mxu0  ;;  %v2160_v54 = vsub.s32 3, %v5534_v32 }
 0x628   :  { %v1996_v56 = vpop.f32.mrb[44].mxu1  ;;  %v2122_v58 = vsel %vm36_vm0, %v5878_v52, 0.0  ;;  %v2130_v60 = vmul.f32 %v5878_v52, %v5878_v52 }
 0x629   :  { %v2108_v1 = vsel %vm36_vm0, %v1996_v56, 0.0  ;;  %v5087_v3 = vpop.f32.mrb[45].mxu1  ;;  %2123 = vadd.xlane.f32.xlu0 %v2122_v58 }
 0x62a   :  { %v2109_v49 = vadd.f32 %v2108_v1, %v2107_v63  ;;  %v1999_v4 = vpop.f32.mrb[46].mxu1  ;;  %v2132_v7 = vsel %vm36_vm0, %v2130_v60, 0.0  ;;  %v2161_v63 = vrot.slane %v5869_v38, %v2160_v54 }
 0x62b   :  { %v5088_v5 = vpop.f32.mrb[47].mxu1 }
 0x62c   :  { %v2045_v6 = vpop.f32.mrb[44].mxu0  ;;  %v5322_v5 = vld [vmem:[%s6383_s6] sm:$0xff]  }
 0x62d   :  { %v2110_v8 = vsel %vm36_vm0, %v2045_v6, 0.0  ;;  %2133 = vadd.xlane.f32.xlu0 %v2132_v7  ;;  %v5093_v28 = vpop.f32.mrb[45].mxu0  ;;  %v5323_v6 = vld [vmem:[%s6383_s6 + $0x8] sm:$0xff]   ;;  %5114 = vmatpush3.bf16.msra.mxu1 %v5322_v5  ;;  %v2175_v7 = vsub.s32 6, %v5534_v32 }
 0x62e   :  { %v2111_v11 = vadd.f32 %v2110_v8, %v2109_v49  ;;  %v2048_v12 = vpop.f32.mrb[46].mxu0  ;;  %5115 = vmatprep.subr.bf16.mxu1 %v5444_v62 }
 0x62f   :  { %v5094_v31 = vpop.f32.mrb[47].mxu0  ;;  %v2176_v8 = vrot.slane %v5869_v38, %v2175_v7 }
 0x630   :  { %v2094_v13 = vpop.f32.mrb[48].mxu1 }
 0x631   :  { %v2112_v15 = vsel %vm36_vm0, %v2094_v13, 0.0  ;;  %v5099_v50 = vpop.f32.mrb[49].mxu1  ;;  %5116 = vmatpush3.bf16.msra.mxu1 %v5323_v6 }
 0x632   :  { %v2113_v16 = vadd.f32 %v2112_v15, %v2111_v11  ;;  %v2097_v18 = vpop.f32.mrb[50].mxu1 }
 0x633   :  { %v5100_v14 = vpop.f32.mrb[51].mxu1 }
 0x634   :  { %v2119_v0 = vadd.f32 %v2117_v40, %v2113_v16  ;;  %v2254_v14 = vsub.s32 5, %v5534_v32 }
 0x636   :  { %v5892_v10 = vadd.f32 %v5434_v19, %v2119_v0  ;;  %v2255_v0 = vrot.slane %v5869_v38, %v2254_v14 }
 0x638   :  { %v2125_v20 = vsel %vm36_vm0, %v5892_v10, 0.0  ;;  %v2131_v57 = vmul.f32 %v5892_v10, %v5892_v10 }
 0x639   :  { %2126 = vadd.xlane.f32.xlu1 %v2125_v20 }
 0x63a   :  { %v2135_v21 = vsel %vm36_vm0, %v2131_v57, 0.0 }
 0x63d   :  { %2136 = vadd.xlane.f32.xlu1 %v2135_v21 }
 0x6b6   :  { %v2124_v59 = vpop.xlane.xlu0 %2123 }
 0x6b7   :  { %v2128_v25 = vmul.f32 0.015625, %v2124_v59 }
 0x6b9   :  { %v2140_v27 = vmul.f32 %v2128_v25, %v2128_v25  ;;  %v2144_v47 = vsub.f32 %v5878_v52, %v2128_v25 }
 0x6ba   :  { %v2134_v24 = vpop.xlane.xlu0 %2133 }
 0x6bb   :  { %v2138_v26 = vmul.f32 0.015625, %v2134_v24 }
 0x6bd   :  { %v2142_v30 = vsub.f32 %v2138_v26, %v2140_v27  ;;  %v5326_v26 = vld [vmem:[%s6378_s3 + $0x44] ss:$8 sps:$4 sm:$0xff]   ;;  %v5324_v27 = vld [vmem:[%s6378_s3 + $0x40] ss:$8 sps:$4 sm:$0xff]  }
 0x6be   :  { %2425 = vmatprep.subr.bf16.mxu1 %v5326_v26 }
 0x6bf   :  { %v2146_v34 = vadd.f32 1e-05, %v2142_v30  ;;  %v5329_v30 = vld [vmem:[%s6378_s3 + $0x54] ss:$8 sps:$4 sm:$0xff]  }
 0x6c1   :  { %5386 = vrsqrt.f32 %v2146_v34  ;;  %v5332_v34 = vld [vmem:[%s6378_s3 + $0x64] ss:$8 sps:$4 sm:$0xff]  }
 0x6c6   :  { %v2127_v35 = vpop.xlane.xlu1 %2126 }
 0x6c7   :  { %v2129_v37 = vmul.f32 0.015625, %v2127_v35  ;;  %v5327_v35 = vld [vmem:[%s6378_s3 + $0x50] ss:$8 sps:$4 sm:$0xff]  }
 0x6c9   :  { %v2141_v41 = vmul.f32 %v2129_v37, %v2129_v37  ;;  %v2145_v55 = vsub.f32 %v5892_v10, %v2129_v37  ;;  %v5330_v37 = vld [vmem:[%s6378_s3 + $0x60] ss:$8 sps:$4 sm:$0xff]  }
 0x6ca   :  { %v2137_v40 = vpop.xlane.xlu1 %2136 }
 0x6cb   :  { %v2139_v42 = vmul.f32 0.015625, %v2137_v40  ;;  %v5387_v46 = vpop.eup %5386  ;;  %v5335_v40 = vld [vmem:[%s6378_s3 + $0x74] ss:$8 sps:$4 sm:$0xff]  }
 0x6cc   :  { %v2150_v48 = vmul.f32 %v5387_v46, %v2144_v47 }
 0x6cd   :  { %v2143_v43 = vsub.f32 %v2139_v42, %v2141_v41  ;;  %v5333_v41 = vld [vmem:[%s6378_s3 + $0x70] ss:$8 sps:$4 sm:$0xff]  }
 0x6ce   :  { %v2156_v60 = vmul.f32 %v2155_v51, %v2150_v48 }
 0x6cf   :  { %v2147_v44 = vadd.f32 1e-05, %v2143_v43 }
 0x6d0   :  { %v2162_v3 = vadd.f32 %v2161_v63, %v2156_v60 }
 0x6d1   :  { %5388 = vrsqrt.f32 %v2147_v44 }
 0x6db   :  { %v5389_v56 = vpop.eup %5388 }
 0x6dc   :  { %v2151_v58 = vmul.f32 %v5389_v56, %v2145_v55 }
 0x6de   :  { %v2157_v1 = vmul.f32 %v2155_v51, %v2151_v58 }
 0x6e0   :  { %v2163_v49 = vadd.f32 %v2161_v63, %v2157_v1 }
 0x6e2   :  { %v2164_v4 = vpack.c.bf16 %v2163_v49, %v2162_v3  ;;  %v4742_v49 = vld [vmem:[%s6379_s1 + $0x8] sm:$0xff] }
 0x6e3   :  { %v2350_v5 = vrot.slane %v4742_v49, %v5537_v33 }
 0x6e4   :  { %5110 = vmatmul.mubr.msk.bf16.vlgmr.msra.gmra.mrb[48].mxu0 %vm36_vm0, %v2164_v4 }
 0x6e5   :  { %5123 = vmatprep.mubr.msk.bf16.mxu0 %vm5445_vm1, %v5444_v62 }
 0x7b7   :  { %v2238_v28 = vpop.f32.mrb[48].mxu0 }
 0x7b8   :  { %v2239_v11 = vadd.f32 %v2238_v28, %v2176_v8  ;;  %v5111_v12 = vpop.f32.mrb[49].mxu0 }
 0x7b9   :  { %v2241_v31 = vpop.f32.mrb[50].mxu0 }
 0x7ba   :  { %v2242_v13 = vadd.f32 %v2241_v31, %v2176_v8  ;;  %v5112_v15 = vpop.f32.mrb[51].mxu0  ;;  %v2245_v50 = vmax.f32 %v2239_v11, 0.0 }
 0x7bc   :  { %v2246_v16 = vmax.f32 %v2242_v13, 0.0  ;;  %v2356_v13 = vrot.slane %v4742_v49, %v5544_v39 }
 0x7be   :  { %v2247_v18 = vpack.c.bf16 %v2246_v16, %v2245_v50 }
 0x7c0   :  { %5118 = vmatmul.mubr.msk.bf16.vlgmr.msra.gmra.mrb[52].mxu1 %vm2268_vm5, %v2247_v18 }
 0x7c1   :  { %2457 = vmatprep.mubr.bf16.mxu1 %v5436_v9  ;;  %2426 = vmatpush1.bf16.msra.mxu1 %v5324_v27 }
 0x7c2   :  { %2427 = vmatprep.subr.bf16.mxu1 %v5329_v30 }
 0x7c5   :  { %2428 = vmatpush1.bf16.msra.mxu1 %v5327_v35 }
 0x7c6   :  { %2429 = vmatprep.subr.bf16.mxu1 %v5332_v34 }
 0x7c9   :  { %2430 = vmatpush1.bf16.msra.mxu1 %v5330_v37 }
 0x7ca   :  { %2431 = vmatprep.subr.bf16.mxu1 %v5335_v40 }
 0x7cd   :  { %2432 = vmatpush1.bf16.msra.mxu1 %v5333_v41 }
 0x7ce   :  { %5133 = vmatprep.subr.bf16.mxu1 %v5444_v62 }
 0x893   :  { %v2306_v19 = vpop.f32.mrb[52].mxu1 }
 0x894   :  { %v2307_v20 = vadd.f32 %v2306_v19, %v2255_v0  ;;  %v5119_v57 = vpop.f32.mrb[53].mxu1 }
 0x895   :  { %v2309_v21 = vpop.f32.mrb[54].mxu1 }
 0x896   :  { %v5947_v22 = vadd.f32 %v2307_v20, %v5878_v52  ;;  %v2310_v23 = vadd.f32 %v2309_v21, %v2255_v0  ;;  %v5120_v2 = vpop.f32.mrb[55].mxu1  ;;  %v4751_v0 = vld [vmem:[%s6380_s2 + $0x1] ss:$2 sm:$0x3] }
 0x897   :  { %v2375_v19 = vrot.slane %v4751_v0, %v5537_v33  ;;  %v2379_v57 = vrot.slane %v4751_v0, %v5544_v39 }
 0x898   :  { %v5950_v61 = vadd.f32 %v2310_v23, %v5892_v10  ;;  %v2317_v59 = vsel %vm36_vm0, %v5947_v22, 0.0  ;;  %v2325_v24 = vmul.f32 %v5947_v22, %v5947_v22 }
 0x899   :  { %2318 = vadd.xlane.f32.xlu0 %v2317_v59 }
 0x89a   :  { %v2320_v38 = vsel %vm36_vm0, %v5950_v61, 0.0  ;;  %v2326_v25 = vmul.f32 %v5950_v61, %v5950_v61  ;;  %v2327_v52 = vsel %vm36_vm0, %v2325_v24, 0.0 }
 0x89b   :  { %2321 = vadd.xlane.f32.xlu1 %v2320_v38 }
 0x89c   :  { %v2330_v10 = vsel %vm36_vm0, %v2326_v25, 0.0 }
 0x89d   :  { %2328 = vadd.xlane.f32.xlu0 %v2327_v52 }
 0x89f   :  { %2331 = vadd.xlane.f32.xlu1 %v2330_v10 }
 0x926   :  { %v2319_v42 = vpop.xlane.xlu0 %2318 }
 0x927   :  { %v2323_v43 = vmul.f32 0.015625, %v2319_v42 }
 0x928   :  { %v2322_v44 = vpop.xlane.xlu1 %2321 }
 0x929   :  { %v2324_v46 = vmul.f32 0.015625, %v2322_v44  ;;  %v2335_v48 = vmul.f32 %v2323_v43, %v2323_v43  ;;  %v2339_v4 = vsub.f32 %v5947_v22, %v2323_v43 }
 0x92a   :  { %v2329_v47 = vpop.xlane.xlu0 %2328 }
 0x92b   :  { %v2333_v51 = vmul.f32 0.015625, %v2329_v47  ;;  %v2336_v56 = vmul.f32 %v2324_v46, %v2324_v46  ;;  %v2340_v8 = vsub.f32 %v5950_v61, %v2324_v46 }
 0x92c   :  { %v2332_v55 = vpop.xlane.xlu1 %2331 }
 0x92d   :  { %v2337_v58 = vsub.f32 %v2333_v51, %v2335_v48  ;;  %v2334_v60 = vmul.f32 0.015625, %v2332_v55 }
 0x92f   :  { %v2341_v63 = vadd.f32 1e-05, %v2337_v58  ;;  %v2338_v1 = vsub.f32 %v2334_v60, %v2336_v56 }
 0x931   :  { %5390 = vrsqrt.f32 %v2341_v63  ;;  %v2342_v3 = vadd.f32 1e-05, %v2338_v1 }
 0x933   :  { %5392 = vrsqrt.f32 %v2342_v3 }
 0x93b   :  { %v5391_v6 = vpop.eup %5390 }
 0x93c   :  { %v2345_v28 = vmul.f32 %v5391_v6, %v2339_v4 }
 0x93d   :  { %v5393_v11 = vpop.eup %5392 }
 0x93e   :  { %v2346_v12 = vmul.f32 %v5393_v11, %v2340_v8  ;;  %v2351_v31 = vmul.f32 %v2350_v5, %v2345_v28 }
 0x940   :  { %v2352_v15 = vmul.f32 %v2350_v5, %v2346_v12  ;;  %v2357_v50 = vadd.f32 %v2356_v13, %v2351_v31 }
 0x942   :  { %v2358_v16 = vadd.f32 %v2356_v13, %v2352_v15 }
 0x944   :  { %v2359_v18 = vpack.c.bf16 %v2358_v16, %v2357_v50 }
 0x946   :  { %4760 = vmatmul.mubr.msk.bf16.vlgmr.msra.gmra.mrb[56].mxu1 %vm36_vm0, %v2359_v18 }
 0x947   :  { %5135 = vmatprep.mubr.msk.bf16.mxu1 %vm5445_vm1, %v5444_v62 }
 0xa19   :  { %v2459_v20 = vpop.f32.mrb[56].mxu1 }
 0xa1a   :  { %v2461_v21 = vpop.f32.mrb[57].mxu1  ;;  %v2460_v2 = vadd.f32 %v2459_v20, %v2375_v19 }
 0xa1b   :  { %v2463_v23 = vpop.f32.mrb[58].mxu1  ;;  %v2462_v38 = vadd.f32 %v2461_v21, %v2379_v57 }
 0xa1c   :  { %v2464_v59 = vadd.f32 %v2463_v23, %v2375_v19  ;;  %v2465_v24 = vpop.f32.mrb[59].mxu1 }
 0xa1d   :  { %v2466_v25 = vadd.f32 %v2465_v24, %v2379_v57 }
 0xa1e   :  { %v2468_v52 = vpack.c.bf16 %v2464_v59, %v2460_v2 }
 0xa1f   :  { %v6002_v10 = vpack.c.bf16 %v2466_v25, %v2462_v38 }
 0xa20   :  { %2473 = vrot.lane.b32.xlu1 %v2468_v52, %s5437_s12  ;;  %2471 = vrot.lane.b32.xlu0 %v2468_v52, %s5438_s13  ;;  %v2496_v46 = vshrl.u32 %v2468_v52, 16 }
 0xa24   :  { %2475 = vrot.lane.b32.xlu1 %v2468_v52, %s5439_s14  ;;  %2479 = vrot.lane.b32.xlu0 %v2468_v52, %s5440_s15 }
 0xa28   :  { %2477 = vrot.lane.b32.xlu1 %v2468_v52, %s5441_s16  ;;  %2483 = vrot.lane.b32.xlu0 %v2468_v52, %s5442_s17 }
 0xa2c   :  { %2481 = vrot.lane.b32.xlu1 %v2468_v52, %s5443_s18 }
 0xa92   :  { %v2474_v26 = vpop.permute.xlu1 %2473  ;;  %v2472_v27 = vpop.permute.xlu0 %2471 }
 0xa93   :  { %v2494_v41 = vpack.i.b16 %v2472_v27, %v2468_v52  ;;  %v2497_v42 = vshrl.u32 %v2472_v27, 16  ;;  %v2504_v51 = vshrl.u32 %v2474_v26, 16 }
 0xa95   :  { %v2498_v49 = vpack.i.b16 %v2497_v42, %v2496_v46 }
 0xa96   :  { %v2476_v30 = vpop.permute.xlu1 %2475  ;;  %v2480_v35 = vpop.permute.xlu0 %2479 }
 0xa97   :  { %v2513_v43 = vshrl.u32 %v2480_v35, 16  ;;  %v2505_v47 = vshrl.u32 %v2476_v30, 16  ;;  %v2502_v60 = vpack.i.b16 %v2476_v30, %v2474_v26 }
 0xa99   :  { %v2506_v4 = vpack.i.b16 %v2505_v47, %v2504_v51 }
 0xa9a   :  { %v2478_v34 = vpop.permute.xlu1 %2477  ;;  %v2484_v44 = vpop.permute.xlu0 %2483 }
 0xa9b   :  { %v2510_v37 = vpack.i.b16 %v2480_v35, %v2478_v34  ;;  %v2512_v40 = vshrl.u32 %v2478_v34, 16  ;;  %v2521_v63 = vshrl.u32 %v2484_v44, 16 }
 0xa9d   :  { %v2514_v55 = vpack.i.b16 %v2513_v43, %v2512_v40  ;;  %v2540_v56 = vcombine.low %v2494_v41, %v2510_v37  ;;  %v2541_v58 = vcombine.high %v2494_v41, %v2510_v37 }
 0xa9e   :  { %v2482_v48 = vpop.permute.xlu1 %2481 }
 0xa9f   :  { %v2518_v1 = vpack.i.b16 %v2484_v44, %v2482_v48  ;;  %v2520_v3 = vshrl.u32 %v2482_v48, 16  ;;  %v2548_v28 = vrot.slane %v2540_v56, %v5569_v17  ;;  %v2555_v11 = vrot.slane %v2541_v58, %v5569_v17 }
 0xaa0   :  { %v2674_v12 = vcombine.low %v2498_v49, %v2514_v55  ;;  %v2675_v31 = vcombine.high %v2498_v49, %v2514_v55 }
 0xaa1   :  { %v2522_v5 = vpack.i.b16 %v2521_v63, %v2520_v3  ;;  %v2556_v6 = vcombine.low %v2502_v60, %v2518_v1  ;;  %v2557_v8 = vcombine.high %v2502_v60, %v2518_v1 }
 0xaa2   :  { %v2682_v57 = vrot.slane %v2674_v12, %v5569_v17  ;;  %v2689_v21 = vrot.slane %v2675_v31, %v5569_v17 }
 0xaa3   :  { %v2564_v13 = vrot.slane %v2556_v6, %v5569_v17  ;;  %v2571_v15 = vrot.slane %v2557_v8, %v5569_v17  ;;  %v2690_v50 = vcombine.low %v2506_v4, %v2522_v5  ;;  %v2691_v16 = vcombine.high %v2506_v4, %v2522_v5 }
 0xaa5   :  { %v2602_v18 = vcombine.low %v2548_v28, %v2564_v13  ;;  %v2603_v0 = vcombine.high %v2548_v28, %v2564_v13  ;;  %v2618_v19 = vcombine.low %v2555_v11, %v2571_v15  ;;  %v2619_v20 = vcombine.high %v2555_v11, %v2571_v15 }
 0xaa6   :  { %v2698_v23 = vrot.slane %v2690_v50, %v5569_v17  ;;  %v2705_v2 = vrot.slane %v2691_v16, %v5569_v17 }
 0xaa7   :  { %v2610_v59 = vrot.slane %v2602_v18, %v5572_v29  ;;  %v2617_v24 = vrot.slane %v2603_v0, %v5572_v29  ;;  %v2626_v27 = vrot.slane %v2618_v19, %v5572_v29  ;;  %v2633_v30 = vrot.slane %v2619_v20, %v5572_v29 }
 0xaa8   :  { %v2736_v38 = vcombine.low %v2682_v57, %v2698_v23  ;;  %v2737_v25 = vcombine.high %v2682_v57, %v2698_v23  ;;  %v2752_v52 = vcombine.low %v2689_v21, %v2705_v2  ;;  %v2753_v26 = vcombine.high %v2689_v21, %v2705_v2 }
 0xaa9   :  { %v4761_v35 = vcombine.low %v2610_v59, %v2617_v24  ;;  %v4763_v34 = vcombine.high %v2610_v59, %v2617_v24  ;;  %v4769_v55 = vcombine.low %v2626_v27, %v2633_v30  ;;  %v4771_v56 = vcombine.high %v2626_v27, %v2633_v30 }
 0xaaa   :  { %v2744_v37 = vrot.slane %v2736_v38, %v5572_v29  ;;  %v2751_v40 = vrot.slane %v2737_v25, %v5572_v29  ;;  %v2760_v41 = vrot.slane %v2752_v52, %v5572_v29  ;;  %v2767_v42 = vrot.slane %v2753_v26, %v5572_v29 }
 0xaab   :  { %v2816_v43 = vrot.slane %v4761_v35, %v5569_v17  ;;  %v2832_v44 = vrot.slane %v4763_v34, %v5569_v17  ;;  %v2934_v5 = vrot.slane %v4769_v55, %v5569_v17  ;;  %v2950_v6 = vrot.slane %v4771_v56, %v5569_v17 }
 0xaac   :  { %v4765_v46 = vcombine.low %v2744_v37, %v2751_v40  ;;  %v4767_v47 = vcombine.high %v2744_v37, %v2751_v40  ;;  %v4773_v48 = vcombine.low %v2760_v41, %v2767_v42  ;;  %v4775_v51 = vcombine.high %v2760_v41, %v2767_v42 }
 0xaad   :  { %v2841_v58 = vcombine.high %v2816_v43, %v2832_v44  ;;  %v2840_v11 = vcombine.low %v2816_v43, %v2832_v44  ;;  %v2959_v50 = vcombine.high %v2934_v5, %v2950_v6  ;;  %v2958_v34 = vcombine.low %v2934_v5, %v2950_v6 }
 0xaae   :  { %v2875_v60 = vrot.slane %v4765_v46, %v5569_v17  ;;  %v2891_v63 = vrot.slane %v4767_v47, %v5569_v17  ;;  %v2993_v49 = vrot.slane %v4773_v48, %v5569_v17  ;;  %v3009_v4 = vrot.slane %v4775_v51, %v5569_v17 }
 0xaaf   :  { %v2855_v1 = vrot.slane %v2841_v58, %v5572_v29  ;;  %v2848_v57 = vrot.slane %v2840_v11, %v5572_v29  ;;  %v2973_v24 = vrot.slane %v2959_v50, %v5572_v29  ;;  %v2966_v51 = vrot.slane %v2958_v34, %v5572_v29 }
 0xab0   :  { %v2900_v3 = vcombine.high %v2875_v60, %v2891_v63  ;;  %v2899_v8 = vcombine.low %v2875_v60, %v2891_v63  ;;  %v3018_v15 = vcombine.high %v2993_v49, %v3009_v4  ;;  %v3017_v30 = vcombine.low %v2993_v49, %v3009_v4 }
 0xab1   :  { %v2865_v31 = vcombine.high %v2855_v1, %v5436_v9  ;;  %v3059_v21 = vshrl.u32 %v2855_v1, 16  ;;  %v2864_v25 = vcombine.high %v2848_v57, %v5436_v9  ;;  %v3047_v43 = vshrl.u32 %v2848_v57, 16 }
 0xab2   :  { %v2914_v28 = vrot.slane %v2900_v3, %v5572_v29  ;;  %v2907_v0 = vrot.slane %v2899_v8, %v5572_v29  ;;  %v3032_v23 = vrot.slane %v3018_v15, %v5572_v29  ;;  %v3025_v46 = vrot.slane %v3017_v30, %v5572_v29 }
 0xab3   :  { %v3065_v41 = vshrl.u32 %v2865_v31, 16  ;;  %v2983_v47 = vcombine.high %v2973_v24, %v5436_v9  ;;  %v3095_v3 = vshrl.u32 %v2973_v24, 16  ;;  %v3053_v49 = vshrl.u32 %v2864_v25, 16 }
 0xab4   :  { %v3058_v12 = vpack.i.b16 %v2914_v28, %v2855_v1  ;;  %v2924_v13 = vcombine.high %v2914_v28, %v5436_v9  ;;  %v3060_v19 = vshrl.u32 %v2914_v28, 16  ;;  %v2923_v59 = vcombine.high %v2907_v0, %v5436_v9 }
 0xab5   :  { %v3046_v38 = vpack.i.b16 %v2907_v0, %v2848_v57  ;;  %v3094_v52 = vpack.i.b16 %v3032_v23, %v2973_v24  ;;  %v3048_v40 = vshrl.u32 %v2907_v0, 16  ;;  %v3042_v42 = vcombine.high %v3032_v23, %v5436_v9 }
 0xab6   :  { %v3120_v16 = vsel %vm841_vm2, %v3058_v12, 0  ;;  %v3064_v18 = vpack.i.b16 %v2924_v13, %v2865_v31  ;;  %v3061_v2 = vpack.i.b16 %v3060_v19, %v3059_v21  ;;  %v3052_v27 = vpack.i.b16 %v2923_v59, %v2864_v25 }
 0xab7   :  { %5122 = vmatpush3.bf16.xpose.msra.mxu0 %v3120_v16  ;;  %v3066_v35 = vshrl.u32 %v2924_v13, 16  ;;  %v3304_v37 = vsel %vm841_vm2, %v3094_v52, 0  ;;  %v3049_v48 = vpack.i.b16 %v3048_v40, %v3047_v43  ;;  %v3100_v55 = vpack.i.b16 %v3042_v42, %v2983_v47 }
 0xab8   :  { %v3212_v20 = vsel %vm841_vm2, %v3064_v18, 0  ;;  %5127 = vmatprep.subr.bf16.mxu0 %v5444_v62  ;;  %v3166_v26 = vsel %vm841_vm2, %v3061_v2, 0  ;;  %v3082_v58 = vpack.i.b16 %v3025_v46, %v2966_v51  ;;  %v3096_v60 = vshrl.u32 %v3032_v23, 16 }
 0xab9   :  { %5134 = vmatpush3.bf16.xpose.msra.mxu1 %v3212_v20  ;;  %v3067_v44 = vpack.i.b16 %v3066_v35, %v3065_v41  ;;  %v3396_v63 = vsel %vm841_vm2, %v3100_v55, 0  ;;  %v3054_v1 = vshrl.u32 %v2923_v59, 16  ;;  %v3041_v5 = vcombine.high %v3025_v46, %v5436_v9 }
 0xaba   :  { %5145 = vmatprep.subr.bf16.mxu1 %v5444_v62  ;;  %v3097_v4 = vpack.i.b16 %v3096_v60, %v3095_v3  ;;  %v2982_v8 = vcombine.high %v2966_v51, %v5436_v9  ;;  %v3102_v12 = vshrl.u32 %v3042_v42, 16  ;;  %v3084_v31 = vshrl.u32 %v3025_v46, 16 }
 0xabb   :  { %v3258_v56 = vsel %vm841_vm2, %v3067_v44, 0  ;;  %v3055_v6 = vpack.i.b16 %v3054_v1, %v3053_v49  ;;  %v3101_v13 = vshrl.u32 %v2983_v47, 16  ;;  %v3083_v15 = vshrl.u32 %v2966_v51, 16 }
 0xabc   :  { %v3350_v28 = vsel %vm841_vm2, %v3097_v4, 0  ;;  %v3088_v11 = vpack.i.b16 %v3041_v5, %v2982_v8  ;;  %v3090_v0 = vshrl.u32 %v3041_v5, 16  ;;  %v3089_v19 = vshrl.u32 %v2982_v8, 16 }
 0xabd   :  { %v3103_v50 = vpack.i.b16 %v3102_v12, %v3101_v13  ;;  %v3085_v16 = vpack.i.b16 %v3084_v31, %v3083_v15 }
 0xabe   :  { %5124 = vmatmul.mubr.msk.bf16.vlgmr.msra.gmra.mrb[52].mxu0 %vm841_vm2, %v3046_v38  ;;  %v3091_v20 = vpack.i.b16 %v3090_v0, %v3089_v19 }
 0xabf   :  { %5128 = vmatpush3.bf16.xpose.msra.mxu0 %v3166_v26  ;;  %5129 = vmatprep.mubr.msk.bf16.mxu0 %vm5445_vm1, %v5444_v62  ;;  %v3442_v18 = vsel %vm841_vm2, %v3103_v50, 0 }
 0xac0   :  { %5136 = vmatmul.mubr.msk.bf16.vlgmr.msra.gmra.mrb[60].mxu1 %vm841_vm2, %v3052_v27  ;;  %5139 = vmatprep.subr.bf16.mxu0 %v5444_v62 }
 0xac1   :  { %5146 = vmatpush3.bf16.xpose.msra.mxu1 %v3304_v37  ;;  %5147 = vmatprep.mubr.msk.bf16.mxu1 %vm5445_vm1, %v5444_v62 }
 0xac2   :  { %5157 = vmatprep.subr.bf16.mxu1 %v5444_v62 }
 0xac6   :  { %5130 = vmatmul.mubr.msk.bf16.vlgmr.msra.gmra.mrb[56].mxu0 %vm841_vm2, %v3049_v48 }
 0xac7   :  { %5140 = vmatpush3.bf16.xpose.msra.mxu0 %v3258_v56  ;;  %5141 = vmatprep.mubr.msk.bf16.mxu0 %vm5445_vm1, %v5444_v62 }
 0xac8   :  { %5148 = vmatmul.mubr.msk.bf16.vlgmr.msra.gmra.mrb[64].mxu1 %vm841_vm2, %v3082_v58  ;;  %5151 = vmatprep.subr.bf16.mxu0 %v5444_v62 }
 0xac9   :  { %5158 = vmatpush3.bf16.xpose.msra.mxu1 %v3396_v63  ;;  %5159 = vmatprep.mubr.msk.bf16.mxu1 %vm5445_vm1, %v5444_v62 }
 0xaca   :  { %5169 = vmatprep.subr.bf16.mxu1 %v5444_v62 }
 0xace   :  { %5142 = vmatmul.mubr.msk.bf16.vlgmr.msra.gmra.mrb[60].mxu0 %vm841_vm2, %v3055_v6 }
 0xacf   :  { %5152 = vmatpush3.bf16.xpose.msra.mxu0 %v3350_v28  ;;  %5153 = vmatprep.mubr.msk.bf16.mxu0 %vm5445_vm1, %v5444_v62 }
 0xad0   :  { %5160 = vmatmul.mubr.msk.bf16.vlgmr.msra.gmra.mrb[68].mxu1 %vm841_vm2, %v3088_v11  ;;  %5163 = vmatprep.subr.bf16.mxu0 %v5444_v62 }
 0xad1   :  { %5171 = vmatprep.mubr.msk.bf16.mxu1 %vm5445_vm1, %v5444_v62 }
 0xad6   :  { %5154 = vmatmul.mubr.msk.bf16.vlgmr.msra.gmra.mrb[64].mxu0 %vm841_vm2, %v3085_v16 }
 0xad7   :  { %5164 = vmatpush3.bf16.xpose.msra.mxu0 %v3442_v18  ;;  %5165 = vmatprep.mubr.msk.bf16.mxu0 %vm5445_vm1, %v5444_v62 }
 0xad8   :  { %5175 = vmatprep.subr.bf16.mxu0 %v5444_v62 }
 0xade   :  { %5166 = vmatmul.mubr.msk.bf16.vlgmr.msra.gmra.mrb[68].mxu0 %vm841_vm2, %v3091_v20 }
 0xadf   :  { %5177 = vmatprep.mubr.msk.bf16.mxu0 %vm5445_vm1, %v5444_v62 }
 0xb91   :  { %v3156_v57 = vpop.f32.mrb[52].mxu0 }
 0xb92   :  { %v3484_v21 = vmul.f32 0.25, %v3156_v57  ;;  %v5125_v23 = vpop.f32.mrb[53].mxu0 }
 0xb93   :  { %v3159_v2 = vpop.f32.mrb[54].mxu0  ;;  %v3248_v59 = vpop.f32.mrb[60].mxu1 }
 0xb94   :  { %v5126_v24 = vpop.f32.mrb[55].mxu0  ;;  %v5137_v38 = vpop.f32.mrb[61].mxu1  ;;  %v3492_v25 = vsel %vm1218_vm3, %v3484_v21, -inf  ;;  %v3486_v40 = vmul.f32 0.25, %v3248_v59 }
 0xb95   :  { %v3251_v52 = vpop.f32.mrb[62].mxu1  ;;  %3493 = vmax.xlane.f32.xlu1 %v3492_v25 }
 0xb96   :  { %v5138_v26 = vpop.f32.mrb[63].mxu1  ;;  %v3498_v51 = vsel %vm1218_vm3, %v3486_v40, -inf }
 0xb99   :  { %v3202_v27 = vpop.f32.mrb[56].mxu0 }
 0xb9a   :  { %v3485_v30 = vmul.f32 0.25, %v3202_v27  ;;  %v5131_v35 = vpop.f32.mrb[57].mxu0 }
 0xb9b   :  { %v3205_v34 = vpop.f32.mrb[58].mxu0  ;;  %v3340_v37 = vpop.f32.mrb[64].mxu1 }
 0xb9c   :  { %v6092_v41 = vmul.f32 0.25, %v3340_v37  ;;  %v5132_v42 = vpop.f32.mrb[59].mxu0  ;;  %v5149_v43 = vpop.f32.mrb[65].mxu1  ;;  %v3495_v44 = vsel %vm1218_vm3, %v3485_v30, -inf }
 0xb9d   :  { %v3343_v46 = vpop.f32.mrb[66].mxu1  ;;  %3496 = vmax.xlane.f32.xlu0 %v3495_v44 }
 0xb9e   :  { %v5150_v47 = vpop.f32.mrb[67].mxu1  ;;  %v3504_v48 = vsel %vm1218_vm3, %v6092_v41, -inf }
 0xb9f   :  { %3505 = vmax.xlane.f32.xlu1 %v3504_v48 }
 0xba1   :  { %3499 = vmax.xlane.f32.xlu0 %v3498_v51  ;;  %v3294_v55 = vpop.f32.mrb[60].mxu0 }
 0xba2   :  { %v3487_v56 = vmul.f32 0.25, %v3294_v55  ;;  %v5143_v58 = vpop.f32.mrb[61].mxu0 }
 0xba3   :  { %v3297_v60 = vpop.f32.mrb[62].mxu0  ;;  %v3432_v63 = vpop.f32.mrb[68].mxu1 }
 0xba4   :  { %v6098_v1 = vmul.f32 0.25, %v3432_v63  ;;  %v5144_v3 = vpop.f32.mrb[63].mxu0  ;;  %v5161_v49 = vpop.f32.mrb[69].mxu1  ;;  %v3501_v4 = vsel %vm1218_vm3, %v3487_v56, -inf }
 0xba5   :  { %v3435_v5 = vpop.f32.mrb[70].mxu1  ;;  %3502 = vmax.xlane.f32.xlu0 %v3501_v4 }
 0xba6   :  { %v5162_v6 = vpop.f32.mrb[71].mxu1  ;;  %v3510_v8 = vsel %vm1218_vm3, %v6098_v1, -inf }
 0xba7   :  { %3511 = vmax.xlane.f32.xlu1 %v3510_v8 }
 0xba9   :  { %v3386_v28 = vpop.f32.mrb[64].mxu0 }
 0xbaa   :  { %v3489_v11 = vmul.f32 0.25, %v3386_v28  ;;  %v5155_v12 = vpop.f32.mrb[65].mxu0 }
 0xbab   :  { %v3389_v31 = vpop.f32.mrb[66].mxu0 }
 0xbac   :  { %v5156_v13 = vpop.f32.mrb[67].mxu0  ;;  %v3507_v15 = vsel %vm1218_vm3, %v3489_v11, -inf }
 0xbad   :  { %3508 = vmax.xlane.f32.xlu0 %v3507_v15 }
 0xbb1   :  { %v3478_v50 = vpop.f32.mrb[68].mxu0 }
 0xbb2   :  { %v3491_v16 = vmul.f32 0.25, %v3478_v50  ;;  %v5167_v18 = vpop.f32.mrb[69].mxu0 }
 0xbb3   :  { %v3481_v0 = vpop.f32.mrb[70].mxu0 }
 0xbb4   :  { %v5168_v19 = vpop.f32.mrb[71].mxu0  ;;  %v3513_v20 = vsel %vm1218_vm3, %v3491_v16, -inf }
 0xbb5   :  { %3514 = vmax.xlane.f32.xlu0 %v3513_v20  ;;  %v2528_v19 = vshrl.u32 %v6002_v10, 16 }
 0xbb8   :  { %2486 = vrot.lane.b32.xlu1 %v6002_v10, %s5438_s13 }
 0xc22   :  { %v3494_v57 = vpop.xlane.xlu1 %3493 }
 0xc23   :  { %v3516_v23 = vsub.f32 %v3484_v21, %v3494_v57 }
 0xc25   :  { %v3524_v2 = vmul.f32 1.442695, %v3516_v23 }
 0xc27   :  { %5394 = vpow2.f32 %v3524_v2 }
 0xc2a   :  { %v3497_v59 = vpop.xlane.xlu0 %3496 }
 0xc2b   :  { %v3517_v24 = vsub.f32 %v3485_v30, %v3497_v59 }
 0xc2c   :  { %v3506_v48 = vpop.xlane.xlu1 %3505 }
 0xc2d   :  { %v3526_v38 = vmul.f32 1.442695, %v3517_v24  ;;  %v3520_v55 = vsub.f32 %v6092_v41, %v3506_v48 }
 0xc2e   :  { %v3500_v21 = vpop.xlane.xlu0 %3499 }
 0xc2f   :  { %5396 = vpow2.f32 %v3526_v38  ;;  %v3518_v30 = vsub.f32 %v3486_v40, %v3500_v21  ;;  %v3532_v63 = vmul.f32 1.442695, %v3520_v55 }
 0xc31   :  { %v6107_v25 = vpop.eup %5394  ;;  %v3528_v37 = vmul.f32 1.442695, %v3518_v30 }
 0xc32   :  { %v3540_v52 = vsel %vm1218_vm3, %v6107_v25, 0.0  ;;  %v3503_v35 = vpop.xlane.xlu0 %3502 }
 0xc33   :  { %3541 = vadd.xlane.f32.xlu1 %v3540_v52  ;;  %v3519_v44 = vsub.f32 %v3487_v56, %v3503_v35  ;;  %5398 = vpow2.f32 %v3528_v37 }
 0xc34   :  { %v3512_v60 = vpop.xlane.xlu1 %3511 }
 0xc35   :  { %v3530_v51 = vmul.f32 1.442695, %v3519_v44  ;;  %v3522_v3 = vsub.f32 %v6098_v1, %v3512_v60 }
 0xc37   :  { %v3536_v49 = vmul.f32 1.442695, %v3522_v3 }
 0xc38   :  { %v2487_v13 = vpop.permute.xlu1 %2486 }
 0xc39   :  { %v6111_v26 = vpop.eup %5396  ;;  %v6146_v0 = vpack.i.b16 %v2487_v13, %v6002_v10 }
 0xc3a   :  { %v3543_v27 = vsel %vm1218_vm3, %v6111_v26, 0.0  ;;  %v3509_v34 = vpop.xlane.xlu0 %3508 }
 0xc3b   :  { %3544 = vadd.xlane.f32.xlu0 %v3543_v27  ;;  %v3521_v42 = vsub.f32 %v3489_v11, %v3509_v34  ;;  %v2579_v24 = vrot.slane %v6146_v0, %v5569_v17 }
 0xc3d   :  { %v3534_v46 = vmul.f32 1.442695, %v3521_v42  ;;  %v6121_v40 = vpop.eup %5398 }
 0xc3e   :  { %v3546_v56 = vsel %vm1218_vm3, %v6121_v40, 0.0 }
 0xc3f   :  { %5400 = vpow2.f32 %v3534_v46 }
 0xc40   :  { %5402 = vpow2.f32 %v3530_v51 }
 0xc42   :  { %v3515_v43 = vpop.xlane.xlu0 %3514 }
 0xc43   :  { %v3523_v47 = vsub.f32 %v3491_v16, %v3515_v43  ;;  %v2529_v16 = vshrl.u32 %v2487_v13, 16 }
 0xc44   :  { %2490 = vrot.lane.b32.xlu1 %v6002_v10, %s5439_s14 }
 0xc45   :  { %v3538_v58 = vmul.f32 1.442695, %v3523_v47  ;;  %v2530_v59 = vpack.i.b16 %v2529_v16, %v2528_v19 }
 0xc47   :  { %5404 = vpow2.f32 %v3538_v58  ;;  %v2713_v35 = vrot.slane %v2530_v59, %v5569_v17 }
 0xc48   :  { %5406 = vpow2.f32 %v3532_v63 }
 0xc49   :  { %v6125_v4 = vpop.eup %5400  ;;  %5408 = vpow2.f32 %v3536_v49 }
 0xc4a   :  { %v6127_v41 = vpop.eup %5402  ;;  %v3555_v5 = vsel %vm1218_vm3, %v6125_v4, 0.0 }
 0xc4b   :  { %v3549_v1 = vsel %vm1218_vm3, %v6127_v41, 0.0 }
 0xc51   :  { %2488 = vrot.lane.b32.xlu0 %v6002_v10, %s5437_s12  ;;  %v6131_v6 = vpop.eup %5404 }
 0xc52   :  { %v3561_v8 = vsel %vm1218_vm3, %v6131_v6, 0.0  ;;  %v6137_v28 = vpop.eup %5406 }
 0xc53   :  { %v3552_v11 = vsel %vm1218_vm3, %v6137_v28, 0.0  ;;  %v6141_v12 = vpop.eup %5408 }
 0xc54   :  { %v3558_v31 = vsel %vm1218_vm3, %v6141_v12, 0.0 }
 0xc68   :  { %3547 = vadd.xlane.f32.xlu1 %v3546_v56 }
 0xc6c   :  { %3556 = vadd.xlane.f32.xlu1 %v3555_v5 }
 0xc70   :  { %3550 = vadd.xlane.f32.xlu0 %v3549_v1  ;;  %3562 = vadd.xlane.f32.xlu1 %v3561_v8 }
 0xc74   :  { %3553 = vadd.xlane.f32.xlu0 %v3552_v11 }
 0xc78   :  { %3559 = vadd.xlane.f32.xlu0 %v3558_v31 }
 0xcc0   :  { %v3542_v15 = vpop.xlane.xlu1 %3541 }
 0xcc1   :  { %5410 = vrcp.f32 %v3542_v15 }
 0xcc4   :  { %v2491_v18 = vpop.permute.xlu1 %2490 }
 0xcc5   :  { %v2537_v57 = vshrl.u32 %v2491_v18, 16 }
 0xcc8   :  { %v3545_v50 = vpop.xlane.xlu0 %3544 }
 0xcc9   :  { %5412 = vrcp.f32 %v3545_v50 }
 0xccb   :  { %v5411_v56 = vpop.eup %5410 }
 0xccc   :  { %v2489_v20 = vpop.permute.xlu0 %2488  ;;  %v3572_v31 = vmul.f32 %v5411_v56, %v6107_v25 }
 0xccd   :  { %v2534_v23 = vpack.i.b16 %v2491_v18, %v2489_v20  ;;  %v2536_v2 = vshrl.u32 %v2489_v20, 16 }
 0xccf   :  { %v2538_v38 = vpack.i.b16 %v2537_v57, %v2536_v2  ;;  %v2594_v52 = vrot.slane %v2534_v23, %v5569_v17 }
 0xcd1   :  { %v2634_v27 = vcombine.low %v2579_v24, %v2594_v52  ;;  %v2635_v21 = vcombine.high %v2579_v24, %v2594_v52  ;;  %v2728_v30 = vrot.slane %v2538_v38, %v5569_v17  ;;  %v2721_v19 = vcombine.high %v2538_v38, %v5733_v53 }
 0xcd3   :  { %v2642_v10 = vrot.slane %v2634_v27, %v5572_v29  ;;  %v2649_v34 = vrot.slane %v2635_v21, %v5572_v29  ;;  %v2768_v37 = vcombine.low %v2713_v35, %v2728_v30  ;;  %v2769_v42 = vcombine.high %v2713_v35, %v2728_v30  ;;  %v5413_v8 = vpop.eup %5412 }
 0xcd4   :  { %v3573_v18 = vmul.f32 %v5413_v8, %v6111_v26  ;;  %v2706_v27 = vcombine.high %v2530_v59, %v5733_v53  ;;  %v2587_v21 = vcombine.high %v2534_v23, %v5733_v53  ;;  %v3580_v35 = vpack.c.bf16 %v3572_v31, %v3572_v31 }
 0xcd5   :  { %v4762_v43 = vcombine.low %v2642_v10, %v2649_v34  ;;  %v4764_v44 = vcombine.high %v2642_v10, %v2649_v34  ;;  %v2776_v46 = vrot.slane %v2768_v37, %v5572_v29  ;;  %v2783_v47 = vrot.slane %v2769_v42, %v5572_v29 }
 0xcd6   :  { %v2572_v26 = vcombine.high %v6146_v0, %v5733_v53  ;;  %v2735_v38 = vrot.slane %v2721_v19, %v5569_v17  ;;  %v3581_v59 = vpack.c.bf16 %v3573_v18, %v3573_v18  ;;  %v2720_v23 = vrot.slane %v2706_v27, %v5569_v17 }
 0xcd7   :  { %v2823_v48 = vrot.slane %v4762_v43, %v5569_v17  ;;  %v2839_v51 = vrot.slane %v4764_v44, %v5569_v17  ;;  %v4766_v55 = vcombine.low %v2776_v46, %v2783_v47  ;;  %v4768_v58 = vcombine.high %v2776_v46, %v2783_v47 }
 0xcd8   :  { %v2601_v34 = vrot.slane %v2587_v21, %v5569_v17  ;;  %v2586_v0 = vrot.slane %v2572_v26, %v5569_v17  ;;  %v2784_v37 = vcombine.low %v2720_v23, %v2735_v38  ;;  %v2785_v42 = vcombine.high %v2720_v23, %v2735_v38 }
 0xcd9   :  { %v2856_v60 = vcombine.low %v2823_v48, %v2839_v51  ;;  %v2882_v63 = vrot.slane %v4766_v55, %v5569_v17  ;;  %v2898_v3 = vrot.slane %v4768_v58, %v5569_v17 }
 0xcda   :  { %v2650_v43 = vcombine.low %v2586_v0, %v2601_v34  ;;  %v2651_v44 = vcombine.high %v2586_v0, %v2601_v34  ;;  %v2792_v46 = vrot.slane %v2784_v37, %v5572_v29  ;;  %v2799_v47 = vrot.slane %v2785_v42, %v5572_v29 }
 0xcdb   :  { %v2863_v49 = vrot.slane %v2856_v60, %v5572_v29  ;;  %v2915_v5 = vcombine.low %v2882_v63, %v2898_v3 }
 0xcdc   :  { %v2658_v48 = vrot.slane %v2650_v43, %v5572_v29  ;;  %v2665_v51 = vrot.slane %v2651_v44, %v5572_v29  ;;  %v4774_v55 = vcombine.low %v2792_v46, %v2799_v47  ;;  %v4776_v58 = vcombine.high %v2792_v46, %v2799_v47 }
 0xcdd   :  { %v2866_v1 = vcombine.high %v2863_v49, %v5436_v9  ;;  %v2922_v11 = vrot.slane %v2915_v5, %v5572_v29  ;;  %v3071_v15 = vshrl.u32 %v2863_v49, 16 }
 0xcde   :  { %v4770_v60 = vcombine.low %v2658_v48, %v2665_v51  ;;  %v4772_v63 = vcombine.high %v2658_v48, %v2665_v51  ;;  %v3016_v56 = vrot.slane %v4776_v58, %v5569_v17  ;;  %v5336_v48 = vld [vmem:[%s6381_s4 + $0x40] sm:$0xff]  }
 0xcdf   :  { %v3070_v13 = vpack.i.b16 %v2922_v11, %v2863_v49  ;;  %v3072_v50 = vshrl.u32 %v2922_v11, 16  ;;  %v2925_v16 = vcombine.high %v2922_v11, %v5436_v9  ;;  %v3077_v20 = vshrl.u32 %v2866_v1, 16 }
 0xce0   :  { %v3000_v49 = vrot.slane %v4774_v55, %v5569_v17  ;;  %v2941_v5 = vrot.slane %v4770_v60, %v5569_v17  ;;  %v5338_v55 = vld [vmem:[%s6381_s4 + $0x50] sm:$0xff]  }
 0xce1   :  { %v3592_v57 = vsel %vm1318_vm4, %v3070_v13, 0  ;;  %v3073_v2 = vpack.i.b16 %v3072_v50, %v3071_v15  ;;  %v3076_v24 = vpack.i.b16 %v2925_v16, %v2866_v1  ;;  %v3078_v52 = vshrl.u32 %v2925_v16, 16 }
 0xce2   :  { %5170 = vmatpush3.bf16.msra.mxu1 %v3592_v57  ;;  %v2957_v1 = vrot.slane %v4772_v63, %v5569_v17  ;;  %v3033_v8 = vcombine.low %v3000_v49, %v3016_v56  ;;  %v5339_v49 = vld [vmem:[%s6381_s4 + $0x58] sm:$0xff]  }
 0xce3   :  { %v3638_v25 = vsel %vm1318_vm4, %v3073_v2, 0  ;;  %5181 = vmatprep.subr.bf16.mxu1 %v5444_v62  ;;  %v3079_v30 = vpack.i.b16 %v3078_v52, %v3077_v20  ;;  %v3684_v10 = vsel %vm1318_vm4, %v3076_v24, 0 }
 0xce4   :  { %5176 = vmatpush3.bf16.msra.mxu0 %v3638_v25  ;;  %v2974_v11 = vcombine.low %v2941_v5, %v2957_v1  ;;  %v3040_v13 = vrot.slane %v3033_v8, %v5572_v29 }
 0xce5   :  { %5172 = vmatmul.mubr.msk.bf16.vlgmr.msra.gmra.mrb[72].mxu1 %vm1218_vm3, %v3580_v35  ;;  %5187 = vmatprep.subr.bf16.mxu0 %v5444_v62  ;;  %v3730_v53 = vsel %vm1318_vm4, %v3079_v30, 0 }
 0xce6   :  { %5182 = vmatpush3.bf16.msra.mxu1 %v3684_v10  ;;  %5183 = vmatprep.mubr.msk.bf16.mxu1 %vm5445_vm1, %v5444_v62  ;;  %v2981_v15 = vrot.slane %v2974_v11, %v5572_v29  ;;  %v3108_v24 = vshrl.u32 %v3040_v13, 16  ;;  %v3043_v27 = vcombine.high %v3040_v13, %v5436_v9 }
 0xce7   :  { %5178 = vmatmul.mubr.msk.bf16.vlgmr.msra.gmra.mrb[72].mxu0 %vm1218_vm3, %v3581_v59  ;;  %5193 = vmatprep.subr.bf16.mxu1 %v5444_v62 }
 0xce8   :  { %5188 = vmatpush3.bf16.msra.mxu0 %v3730_v53  ;;  %5189 = vmatprep.mubr.msk.bf16.mxu0 %vm5445_vm1, %v5444_v62  ;;  %v3106_v20 = vpack.i.b16 %v3040_v13, %v2981_v15  ;;  %v2984_v35 = vcombine.high %v2981_v15, %v5436_v9  ;;  %v3114_v34 = vshrl.u32 %v3043_v27, 16  ;;  %v5340_v13 = vld [vmem:[%s6381_s4 + $0x60] sm:$0xff]  }
 0xce9   :  { %5199 = vmatprep.subr.bf16.mxu0 %v5444_v62 }
 0xcea   :  { %v3776_v17 = vsel %vm1318_vm4, %v3106_v20, 0  ;;  %v3112_v59 = vpack.i.b16 %v3043_v27, %v2984_v35  ;;  %v3113_v9 = vshrl.u32 %v2984_v35, 16  ;;  %v5341_v20 = vld [vmem:[%s6381_s4 + $0x68] sm:$0xff]  }
 0xcec   :  { %v3115_v37 = vpack.i.b16 %v3114_v34, %v3113_v9 }
 0xcf5   :  { %v3548_v3 = vpop.xlane.xlu1 %3547 }
 0xcf6   :  { %5414 = vrcp.f32 %v3548_v3 }
 0xcf9   :  { %v3557_v16 = vpop.xlane.xlu1 %3556 }
 0xcfd   :  { %v3551_v31 = vpop.xlane.xlu0 %3550  ;;  %v3563_v29 = vpop.xlane.xlu1 %3562 }
 0xcfe   :  { %5416 = vrcp.f32 %v3551_v31 }
 0xd00   :  { %v5415_v50 = vpop.eup %5414 }
 0xd01   :  { %v3574_v18 = vmul.f32 %v5415_v50, %v6121_v40  ;;  %v3554_v19 = vpop.xlane.xlu0 %3553  ;;  %v3107_v40 = vshrl.u32 %v2981_v15, 16 }
 0xd02   :  { %5418 = vrcp.f32 %v3554_v19 }
 0xd03   :  { %5420 = vrcp.f32 %v3557_v16  ;;  %v3582_v57 = vpack.c.bf16 %v3574_v18, %v3574_v18  ;;  %v3109_v25 = vpack.i.b16 %v3108_v24, %v3107_v40  ;;  %v5342_v40 = vld [vmem:[%s6381_s4 + $0x70] sm:$0xff]  }
 0xd05   :  { %5184 = vmatmul.mubr.msk.bf16.vlgmr.msra.gmra.mrb[76].mxu1 %vm1218_vm3, %v3582_v57  ;;  %v3560_v2 = vpop.xlane.xlu0 %3559  ;;  %v3822_v23 = vsel %vm1318_vm4, %v3109_v25, 0 }
 0xd06   :  { %5194 = vmatpush3.bf16.msra.mxu1 %v3776_v17  ;;  %5422 = vrcp.f32 %v3560_v2  ;;  %5195 = vmatprep.mubr.msk.bf16.mxu1 %vm5445_vm1, %v5444_v62 }
 0xd07   :  { %5205 = vmatprep.subr.bf16.mxu1 %v5444_v62  ;;  %5424 = vrcp.f32 %v3563_v29 }
 0xd08   :  { %v5417_v52 = vpop.eup %5416 }
 0xd09   :  { %v3575_v21 = vmul.f32 %v5417_v52, %v6127_v41 }
 0xd0b   :  { %v3583_v26 = vpack.c.bf16 %v3575_v21, %v3575_v21 }
 0xd0c   :  { %v5419_v30 = vpop.eup %5418 }
 0xd0d   :  { %v5421_v38 = vpop.eup %5420  ;;  %v3576_v10 = vmul.f32 %v5419_v30, %v6137_v28  ;;  %5190 = vmatmul.mubr.msk.bf16.vlgmr.msra.gmra.mrb[76].mxu0 %vm1218_vm3, %v3583_v26  ;;  %v3868_v28 = vsel %vm1318_vm4, %v3112_v59, 0  ;;  %v5343_v30 = vld [vmem:[%s6381_s4 + $0x78] sm:$0xff]  }
 0xd0e   :  { %5200 = vmatpush3.bf16.msra.mxu0 %v3822_v23  ;;  %5201 = vmatprep.mubr.msk.bf16.mxu0 %vm5445_vm1, %v5444_v62  ;;  %v3577_v0 = vmul.f32 %v5421_v38, %v6125_v4  ;;  %v3914_v4 = vsel %vm1318_vm4, %v3115_v37, 0 }
 0xd0f   :  { %v3584_v53 = vpack.c.bf16 %v3576_v10, %v3576_v10  ;;  %5211 = vmatprep.subr.bf16.mxu0 %v5444_v62 }
 0xd10   :  { %v5423_v41 = vpop.eup %5422  ;;  %v3585_v43 = vpack.c.bf16 %v3577_v0, %v3577_v0 }
 0xd11   :  { %5196 = vmatmul.mubr.msk.bf16.vlgmr.msra.gmra.mrb[80].mxu1 %vm1218_vm3, %v3584_v53  ;;  %v3578_v42 = vmul.f32 %v5423_v41, %v6141_v12  ;;  %v5425_v44 = vpop.eup %5424 }
 0xd12   :  { %5206 = vmatpush3.bf16.msra.mxu1 %v3868_v28  ;;  %5207 = vmatprep.mubr.msk.bf16.mxu1 %vm5445_vm1, %v5444_v62  ;;  %v3579_v47 = vmul.f32 %v5425_v44, %v6131_v6  ;;  %v5337_v6 = vld [vmem:[%s6381_s4 + $0x48] sm:$0xff]  }
 0xd13   :  { %5217 = vmatprep.subr.bf16.mxu1 %v5444_v62  ;;  %v3586_v46 = vpack.c.bf16 %v3578_v42, %v3578_v42 }
 0xd14   :  { %v3587_v12 = vpack.c.bf16 %v3579_v47, %v3579_v47 }
 0xd15   :  { %5202 = vmatmul.mubr.msk.bf16.vlgmr.msra.gmra.mrb[80].mxu0 %vm1218_vm3, %v3585_v43 }
 0xd16   :  { %5212 = vmatpush3.bf16.msra.mxu0 %v3914_v4  ;;  %5213 = vmatprep.mubr.msk.bf16.mxu0 %vm5445_vm1, %v5444_v62 }
 0xd17   :  { %5223 = vmatprep.subr.bf16.mxu0 %v5444_v62 }
 0xd19   :  { %5208 = vmatmul.mubr.msk.bf16.vlgmr.msra.gmra.mrb[84].mxu1 %vm1218_vm3, %v3586_v46 }
 0xd1a   :  { %5219 = vmatprep.mubr.msk.bf16.mxu1 %vm5445_vm1, %v5444_v62  ;;  %5218 = vmatpush3.bf16.msra.mxu1 %v5336_v48 }
 0xd1b   :  { %5229 = vmatprep.subr.bf16.mxu1 %v5444_v62 }
 0xd1d   :  { %5214 = vmatmul.mubr.msk.bf16.vlgmr.msra.gmra.mrb[84].mxu0 %vm1218_vm3, %v3587_v12 }
 0xd1e   :  { %5225 = vmatprep.mubr.msk.bf16.mxu0 %vm5445_vm1, %v5444_v62  ;;  %5224 = vmatpush3.bf16.msra.mxu0 %v5337_v6 }
 0xd1f   :  { %5235 = vmatprep.subr.bf16.mxu0 %v5444_v62 }
 0xdb8   :  { %v3628_v51 = vpop.f32.mrb[72].mxu1 }
 0xdb9   :  { %v3956_v58 = vpack.c.bf16 %v3628_v51, %v3628_v51  ;;  %v5173_v60 = vpop.f32.mrb[73].mxu1 }
 0xdba   :  { %v3631_v63 = vpop.f32.mrb[74].mxu1  ;;  %v3674_v3 = vpop.f32.mrb[72].mxu0 }
 0xdbb   :  { %v3957_v56 = vpack.c.bf16 %v3674_v3, %v3674_v3  ;;  %v5174_v5 = vpop.f32.mrb[75].mxu1  ;;  %v5179_v1 = vpop.f32.mrb[73].mxu0  ;;  %5220 = vmatmul.mubr.msk.bf16.vlgmr.msra.gmra.mrb[88].mxu1 %vm841_vm2, %v3956_v58 }
 0xdbc   :  { %v3677_v8 = vpop.f32.mrb[74].mxu0  ;;  %5230 = vmatpush3.bf16.msra.mxu1 %v5338_v55  ;;  %5231 = vmatprep.mubr.msk.bf16.mxu1 %vm5445_vm1, %v5444_v62 }
 0xdbd   :  { %v5180_v11 = vpop.f32.mrb[75].mxu0  ;;  %5226 = vmatmul.mubr.msk.bf16.vlgmr.msra.gmra.mrb[88].mxu0 %vm841_vm2, %v3957_v56  ;;  %5241 = vmatprep.subr.bf16.mxu1 %v5444_v62 }
 0xdbe   :  { %5236 = vmatpush3.bf16.msra.mxu0 %v5339_v49  ;;  %5237 = vmatprep.mubr.msk.bf16.mxu0 %vm5445_vm1, %v5444_v62  ;;  %v6297_v11 = vld [vmem:[%s6379_s1 + $0x8] sm:$0xff] }
 0xdbf   :  { %5247 = vmatprep.subr.bf16.mxu0 %v5444_v62 }
 0xdd8   :  { %v3720_v31 = vpop.f32.mrb[76].mxu1 }
 0xdd9   :  { %v3958_v15 = vpack.c.bf16 %v3720_v31, %v3720_v31  ;;  %v5185_v50 = vpop.f32.mrb[77].mxu1  ;;  %v4390_v31 = vrot.slane %v6297_v11, %v2116_v36 }
 0xdda   :  { %v3723_v16 = vpop.f32.mrb[78].mxu1 }
 0xddb   :  { %v5186_v18 = vpop.f32.mrb[79].mxu1  ;;  %5232 = vmatmul.mubr.msk.bf16.vlgmr.msra.gmra.mrb[92].mxu1 %vm841_vm2, %v3958_v15 }
 0xddc   :  { %5242 = vmatpush3.bf16.msra.mxu1 %v5340_v13  ;;  %5243 = vmatprep.mubr.msk.bf16.mxu1 %vm5445_vm1, %v5444_v62 }
 0xddd   :  { %5253 = vmatprep.subr.bf16.mxu1 %v5444_v62 }
 0xde0   :  { %v3766_v19 = vpop.f32.mrb[76].mxu0 }
 0xde1   :  { %v3959_v57 = vpack.c.bf16 %v3766_v19, %v3766_v19  ;;  %v5191_v17 = vpop.f32.mrb[77].mxu0 }
 0xde2   :  { %v3769_v2 = vpop.f32.mrb[78].mxu0 }
 0xde3   :  { %v5192_v24 = vpop.f32.mrb[79].mxu0  ;;  %5238 = vmatmul.mubr.msk.bf16.vlgmr.msra.gmra.mrb[92].mxu0 %vm841_vm2, %v3959_v57 }
 0xde4   :  { %v3812_v29 = vpop.f32.mrb[80].mxu1  ;;  %5248 = vmatpush3.bf16.msra.mxu0 %v5341_v20  ;;  %5249 = vmatprep.mubr.msk.bf16.mxu0 %vm5445_vm1, %v5444_v62 }
 0xde5   :  { %v3960_v52 = vpack.c.bf16 %v3812_v29, %v3812_v29  ;;  %v5197_v27 = vpop.f32.mrb[81].mxu1  ;;  %5259 = vmatprep.subr.bf16.mxu0 %v5444_v62 }
 0xde6   :  { %v3815_v21 = vpop.f32.mrb[82].mxu1 }
 0xde7   :  { %v5198_v25 = vpop.f32.mrb[83].mxu1  ;;  %5244 = vmatmul.mubr.msk.bf16.vlgmr.msra.gmra.mrb[96].mxu1 %vm841_vm2, %v3960_v52 }
 0xde8   :  { %5254 = vmatpush3.bf16.msra.mxu1 %v5342_v40  ;;  %5255 = vmatprep.mubr.msk.bf16.mxu1 %vm5445_vm1, %v5444_v62  ;;  %v3858_v35 = vpop.f32.mrb[80].mxu0 }
 0xde9   :  { %5265 = vmatprep.subr.bf16.mxu1 %v5444_v62  ;;  %v3961_v26 = vpack.c.bf16 %v3858_v35, %v3858_v35  ;;  %v5203_v38 = vpop.f32.mrb[81].mxu0 }
 0xdea   :  { %v3861_v10 = vpop.f32.mrb[82].mxu0 }
 0xdeb   :  { %v5204_v59 = vpop.f32.mrb[83].mxu0  ;;  %5250 = vmatmul.mubr.msk.bf16.vlgmr.msra.gmra.mrb[96].mxu0 %vm841_vm2, %v3961_v26 }
 0xdec   :  { %v3904_v23 = vpop.f32.mrb[84].mxu1  ;;  %5260 = vmatpush3.bf16.msra.mxu0 %v5343_v30  ;;  %5261 = vmatprep.mubr.msk.bf16.mxu0 %vm5445_vm1, %v5444_v62 }
 0xded   :  { %v3962_v34 = vpack.c.bf16 %v3904_v23, %v3904_v23  ;;  %v5209_v53 = vpop.f32.mrb[85].mxu1  ;;  %5277 = vmatprep.subr.bf16.mxu0 %v5444_v62 }
 0xdee   :  { %v3907_v41 = vpop.f32.mrb[86].mxu1 }
 0xdef   :  { %v5210_v0 = vpop.f32.mrb[87].mxu1  ;;  %5256 = vmatmul.mubr.msk.bf16.vlgmr.msra.gmra.mrb[100].mxu1 %vm841_vm2, %v3962_v34 }
 0xdf0   :  { %5273 = vmatprep.mubr.msk.bf16.mxu1 %vm5445_vm1, %v5444_v62  ;;  %v3950_v9 = vpop.f32.mrb[84].mxu0 }
 0xdf1   :  { %v3963_v28 = vpack.c.bf16 %v3950_v9, %v3950_v9  ;;  %v5215_v37 = vpop.f32.mrb[85].mxu0 }
 0xdf2   :  { %v3953_v42 = vpop.f32.mrb[86].mxu0 }
 0xdf3   :  { %v5216_v43 = vpop.f32.mrb[87].mxu0  ;;  %5262 = vmatmul.mubr.msk.bf16.vlgmr.msra.gmra.mrb[100].mxu0 %vm841_vm2, %v3963_v28 }
 0xdf4   :  { %5281 = vmatprep.mubr.msk.bf16.mxu0 %vm5445_vm1, %v5444_v62 }
 0xe8e   :  { %v4024_v44 = vpop.f32.mrb[88].mxu1 }
 0xe8f   :  { %v5221_v4 = vpop.f32.mrb[89].mxu1  ;;  %v4373_v12 = vsel %vm36_vm0, %v4024_v44, 0.0 }
 0xe90   :  { %v4027_v46 = vpop.f32.mrb[90].mxu1  ;;  %v4073_v47 = vpop.f32.mrb[88].mxu0 }
 0xe91   :  { %v4374_v48 = vsel %vm36_vm0, %v4073_v47, 0.0  ;;  %v5222_v6 = vpop.f32.mrb[91].mxu1  ;;  %v5227_v51 = vpop.f32.mrb[89].mxu0  ;;  %v5344_v47 = vld [vmem:[%s6382_s5 + $0x20] sm:$0xff]  }
 0xe92   :  { %v4375_v55 = vadd.f32 %v4374_v48, %v4373_v12  ;;  %v4076_v58 = vpop.f32.mrb[90].mxu0  ;;  %5266 = vmatpush3.bf16.msra.mxu1 %v5344_v47  ;;  %v5346_v12 = vld [vmem:[%s6382_s5 + $0x30] sm:$0xff]   ;;  %v5347_v48 = vld [vmem:[%s6382_s5 + $0x38] sm:$0xff]  }
 0xe93   :  { %v5228_v60 = vpop.f32.mrb[91].mxu0  ;;  %5267 = vmatprep.subr.bf16.mxu1 %v5444_v62 }
 0xeae   :  { %v4122_v63 = vpop.f32.mrb[92].mxu1 }
 0xeaf   :  { %v4376_v3 = vsel %vm36_vm0, %v4122_v63, 0.0  ;;  %v5233_v49 = vpop.f32.mrb[93].mxu1 }
 0xeb0   :  { %v4377_v56 = vadd.f32 %v4376_v3, %v4375_v55  ;;  %v4125_v5 = vpop.f32.mrb[94].mxu1 }
 0xeb1   :  { %v5234_v1 = vpop.f32.mrb[95].mxu1 }
 0xeb6   :  { %v4171_v8 = vpop.f32.mrb[92].mxu0 }
 0xeb7   :  { %v4378_v13 = vsel %vm36_vm0, %v4171_v8, 0.0  ;;  %v5239_v15 = vpop.f32.mrb[93].mxu0 }
 0xeb8   :  { %v4379_v50 = vadd.f32 %v4378_v13, %v4377_v56  ;;  %v4174_v16 = vpop.f32.mrb[94].mxu0 }
 0xeb9   :  { %v5240_v18 = vpop.f32.mrb[95].mxu0 }
 0xeba   :  { %v4220_v19 = vpop.f32.mrb[96].mxu1  ;;  %v4391_v20 = vadd.f32 %v4390_v31, %v4379_v50  ;;  %v4428_v18 = vrot.slane %v6297_v11, %v5916_v45 }
 0xebb   :  { %v5245_v57 = vpop.f32.mrb[97].mxu1  ;;  %v4380_v52 = vsel %vm36_vm0, %v4220_v19, 0.0 }
 0xebc   :  { %v4223_v17 = vpop.f32.mrb[98].mxu1  ;;  %v6304_v2 = vadd.f32 %v4391_v20, %v5947_v22 }
 0xebd   :  { %v5246_v24 = vpop.f32.mrb[99].mxu1 }
 0xebe   :  { %v4269_v29 = vpop.f32.mrb[96].mxu0  ;;  %v4395_v40 = vsel %vm36_vm0, %v6304_v2, 0.0  ;;  %v4403_v36 = vmul.f32 %v6304_v2, %v6304_v2  ;;  %v4434_v24 = vrot.slane %v6297_v11, %v2160_v54  ;;  %v4450_v54 = vrot.slane %v6297_v11, %v2175_v7 }
 0xebf   :  { %v4381_v27 = vsel %vm36_vm0, %v4269_v29, 0.0  ;;  %4396 = vadd.xlane.f32.xlu0 %v4395_v40  ;;  %v5251_v21 = vpop.f32.mrb[97].mxu0 }
 0xec0   :  { %v4382_v25 = vadd.f32 %v4381_v27, %v4380_v52  ;;  %v4272_v35 = vpop.f32.mrb[98].mxu0  ;;  %v4405_v10 = vsel %vm36_vm0, %v4403_v36, 0.0  ;;  %v5348_v27 = vld [vmem:[%s6383_s6 + $0x10] sm:$0xff]   ;;  %v5349_v21 = vld [vmem:[%s6383_s6 + $0x18] sm:$0xff]  }
 0xec1   :  { %v5252_v30 = vpop.f32.mrb[99].mxu0  ;;  %5278 = vmatpush3.bf16.msra.mxu0 %v5348_v27 }
 0xec2   :  { %v4318_v26 = vpop.f32.mrb[100].mxu1  ;;  %5279 = vmatprep.subr.bf16.mxu0 %v5444_v62 }
 0xec3   :  { %v4383_v22 = vsel %vm36_vm0, %v4318_v26, 0.0  ;;  %v5257_v38 = vpop.f32.mrb[101].mxu1  ;;  %4406 = vadd.xlane.f32.xlu0 %v4405_v10 }
 0xec4   :  { %v4384_v59 = vadd.f32 %v4383_v22, %v4382_v25  ;;  %v4321_v23 = vpop.f32.mrb[102].mxu1 }
 0xec5   :  { %v5258_v34 = vpop.f32.mrb[103].mxu1  ;;  %5280 = vmatpush3.bf16.msra.mxu0 %v5349_v21 }
 0xec6   :  { %v4367_v53 = vpop.f32.mrb[100].mxu0 }
 0xec7   :  { %v4385_v41 = vsel %vm36_vm0, %v4367_v53, 0.0  ;;  %v5263_v0 = vpop.f32.mrb[101].mxu0 }
 0xec8   :  { %v4386_v9 = vadd.f32 %v4385_v41, %v4384_v59  ;;  %v4370_v28 = vpop.f32.mrb[102].mxu0 }
 0xec9   :  { %v5264_v37 = vpop.f32.mrb[103].mxu0 }
 0xeca   :  { %v4392_v42 = vadd.f32 %v4390_v31, %v4386_v9 }
 0xecc   :  { %v6316_v43 = vadd.f32 %v4392_v42, %v5950_v61  ;;  %v5345_v61 = vld [vmem:[%s6382_s5 + $0x28] sm:$0xff]  }
 0xecd   :  { %5268 = vmatpush3.bf16.msra.mxu1 %v5345_v61 }
 0xece   :  { %v4398_v44 = vsel %vm36_vm0, %v6316_v43, 0.0  ;;  %v4404_v4 = vmul.f32 %v6316_v43, %v6316_v43  ;;  %5269 = vmatprep.subr.bf16.mxu1 %v5444_v62 }
 0xecf   :  { %4399 = vadd.xlane.f32.xlu1 %v4398_v44 }
 0xed0   :  { %v4408_v46 = vsel %vm36_vm0, %v4404_v4, 0.0 }
 0xed1   :  { %5270 = vmatpush3.bf16.msra.mxu1 %v5346_v12 }
 0xed2   :  { %5271 = vmatprep.subr.bf16.mxu1 %v5444_v62  ;;  %v4530_v62 = vrot.slane %v6297_v11, %v2254_v14 }
 0xed3   :  { %4409 = vadd.xlane.f32.xlu1 %v4408_v46 }
 0xed5   :  { %5272 = vmatpush3.bf16.msra.mxu1 %v5347_v48 }
 0xf4c   :  { %v4397_v6 = vpop.xlane.xlu0 %4396 }
 0xf4d   :  { %v4401_v55 = vmul.f32 0.015625, %v4397_v6  ;;  %v5448_v6 = vmov 1966171168  }
 0xf4f   :  { %v4413_v60 = vmul.f32 %v4401_v55, %v4401_v55  ;;  %v4417_v50 = vsub.f32 %v6304_v2, %v4401_v55 }
 0xf50   :  { %v4407_v51 = vpop.xlane.xlu0 %4406 }
 0xf51   :  { %v4411_v58 = vmul.f32 0.015625, %v4407_v51  ;;  %v4621_v51 = vunpack.c.l.s4 %v5448_v6 }
 0xf53   :  { %v4415_v63 = vsub.f32 %v4411_v58, %v4413_v60  ;;  %v4622_v60 = vunpack.c.0.s8 %v4621_v51 }
 0xf55   :  { %v4419_v49 = vadd.f32 1e-05, %v4415_v63 }
 0xf57   :  { %5426 = vrsqrt.f32 %v4419_v49 }
 0xf5c   :  { %v4400_v3 = vpop.xlane.xlu1 %4399 }
 0xf5d   :  { %v4402_v56 = vmul.f32 0.015625, %v4400_v3 }
 0xf5f   :  { %v4414_v1 = vmul.f32 %v4402_v56, %v4402_v56  ;;  %v4418_v19 = vsub.f32 %v6316_v43, %v4402_v56 }
 0xf60   :  { %v4410_v5 = vpop.xlane.xlu1 %4409 }
 0xf61   :  { %v4412_v8 = vmul.f32 0.015625, %v4410_v5  ;;  %v5427_v15 = vpop.eup %5426  ;;  %v4625_v5 = vsub.s32 %v4622_v60, %v5534_v32 }
 0xf62   :  { %v4423_v16 = vmul.f32 %v5427_v15, %v4417_v50 }
 0xf63   :  { %v4416_v31 = vsub.f32 %v4412_v8, %v4414_v1 }
 0xf64   :  { %v4429_v17 = vmul.f32 %v4428_v18, %v4423_v16 }
 0xf65   :  { %v4420_v13 = vadd.f32 1e-05, %v4416_v31  ;;  %v4644_v31 = vld [vmem:[%s6385_s8] sm:$0x1] }
 0xf66   :  { %v4435_v40 = vadd.f32 %v4434_v24, %v4429_v17 }
 0xf67   :  { %5428 = vrsqrt.f32 %v4420_v13 }
 0xf71   :  { %v5429_v20 = vpop.eup %5428 }
 0xf72   :  { %v4424_v57 = vmul.f32 %v5429_v20, %v4418_v19 }
 0xf74   :  { %v4430_v29 = vmul.f32 %v4428_v18, %v4424_v57 }
 0xf76   :  { %v4436_v36 = vadd.f32 %v4434_v24, %v4430_v29 }
 0xf78   :  { %v4437_v52 = vpack.c.bf16 %v4436_v36, %v4435_v40 }
 0xf7a   :  { %5274 = vmatmul.mubr.msk.bf16.vlgmr.msra.gmra.mrb[104].mxu1 %vm36_vm0, %v4437_v52 }
0x104d   :  { %v4512_v25 = vpop.f32.mrb[104].mxu1 }
0x104e   :  { %v4513_v35 = vadd.f32 %v4512_v25, %v4450_v54  ;;  %v5275_v30 = vpop.f32.mrb[105].mxu1 }
0x104f   :  { %v4515_v26 = vpop.f32.mrb[106].mxu1 }
0x1050   :  { %v4516_v22 = vadd.f32 %v4515_v26, %v4450_v54  ;;  %v5276_v38 = vpop.f32.mrb[107].mxu1  ;;  %v4519_v10 = vmax.f32 %v4513_v35, 0.0 }
0x1052   :  { %v4520_v59 = vmax.f32 %v4516_v22, 0.0 }
0x1054   :  { %v4521_v23 = vpack.c.bf16 %v4520_v59, %v4519_v10 }
0x1056   :  { %5282 = vmatmul.mubr.msk.bf16.vlgmr.msra.gmra.mrb[104].mxu0 %vm2268_vm5, %v4521_v23 }
0x1129   :  { %v4580_v34 = vpop.f32.mrb[104].mxu0 }
0x112a   :  { %v4581_v53 = vadd.f32 %v4580_v34, %v4530_v62  ;;  %v5283_v41 = vpop.f32.mrb[105].mxu0 }
0x112b   :  { %v4583_v0 = vpop.f32.mrb[106].mxu0 }
0x112c   :  { %v4587_v7 = vadd.f32 %v4581_v53, %v6304_v2  ;;  %v4584_v9 = vadd.f32 %v4583_v0, %v4530_v62  ;;  %v5284_v28 = vpop.f32.mrb[107].mxu0 }
0x112e   :  { %4589 = vst.msk [vmem:[#allocation2] sm:$0xff] %vm36_vm0, %v4587_v7  ;;  %v4588_v37 = vadd.f32 %v4584_v9, %v6316_v43  ;;  %v4592_v43 = vld [vmem:[%s6384_s7] sm:$0x7] }
0x112f   :  { %v4612_v58 = vrot.slane %v4592_v43, %v5537_v33  ;;  %v4617_v49 = vrot.slane %v4592_v43, %v5544_v39  ;;  %v4657_v39 = vrot.slane %v4592_v43, %v5916_v45 }
0x1130   :  { %4590 = vst.msk [vmem:[#allocation2 + $0x8] sm:$0xff] %vm36_vm0, %v4588_v37 }
0x1137   :  { %v4591_v42 = vld [vmem:[#allocation2] ss:$8 sm:$0x3] }
0x1138   :  { %v4594_v44 = vsel %vm4593_vm6, %v4591_v42, 0.0  ;;  %v4598_v4 = vmul.f32 %v4591_v42, %v4591_v42 }
0x1139   :  { %4595 = vadd.xlane.f32.xlu0 %v4594_v44 }
0x113a   :  { %v4599_v14 = vsel %vm4593_vm6, %v4598_v4, 0.0 }
0x113b   :  { %4600 = vadd.xlane.f32.xlu1 %v4599_v14 }
0x11c6   :  { %v4596_v11 = vpop.xlane.xlu0 %4595 }
0x11c7   :  { %v4597_v46 = vmul.f32 0.015625, %v4596_v11 }
0x11c8   :  { %v4601_v47 = vpop.xlane.xlu1 %4600 }
0x11c9   :  { %v4603_v61 = vmul.f32 %v4597_v46, %v4597_v46  ;;  %v4602_v2 = vmul.f32 0.015625, %v4601_v47  ;;  %v4605_v55 = vsub.f32 %v4591_v42, %v4597_v46 }
0x11cb   :  { %v4604_v12 = vsub.f32 %v4602_v2, %v4603_v61 }
0x11cd   :  { %v4606_v48 = vadd.f32 1e-05, %v4604_v12 }
0x11cf   :  { %5430 = vrsqrt.f32 %v4606_v48 }
0x11d9   :  { %v5431_v63 = vpop.eup %5430 }
0x11da   :  { %v4608_v3 = vmul.f32 %v5431_v63, %v4605_v55 }
0x11dc   :  { %v4613_v56 = vmul.f32 %v4612_v58, %v4608_v3 }
0x11de   :  { %v4618_v1 = vadd.f32 %v4617_v49, %v4613_v56 }
0x11e0   :  { %v4626_v8 = vrot.slane %v4618_v1, %v4625_v5 }
0x11e2   :  { %v4634_v13 = vrot.slane %v4626_v8, %v4625_v5  ;;  %v4627_v15 = vcombine.high %v4626_v8, %v4626_v8 }
0x11e4   :  { %v4645_v50 = vmul.f32 %v4644_v31, %v4634_v13  ;;  %v4641_v16 = vrot.slane %v4627_v15, %v4625_v5 }
0x11e6   :  { %v4648_v33 = vsel %vm4647_vm7, %v4645_v50, 0.0  ;;  %v4646_v18 = vmul.f32 %v4644_v31, %v4641_v16 }
0x11e7   :  { %4649 = vadd.xlane.f32.xlu1 %v4648_v33 }
0x11e8   :  { %v4651_v19 = vsel %vm4647_vm7, %v4646_v18, 0.0 }
0x11e9   :  { %4652 = vadd.xlane.f32.xlu0 %v4651_v19 }
0x11ff   :  { %4660 = vbcast.lane.b32.xlu0 %v4657_v39, 256 }
0x1274   :  { %v4650_v17 = vpop.xlane.xlu1 %4649 }
0x1276   :  { %v4653_v32 = vpop.xlane.xlu0 %4652 }
0x127a   :  { %v4661_v20 = vpop.permute.xlu0 %4660 }
0x127b   :  { %v4664_v57 = vadd.f32 %v4661_v20, %v4653_v32  ;;  %v4663_v24 = vadd.f32 %v4661_v20, %v4650_v17 }
0x127d   :  { %v4667_v29 = vrot.slane %v4664_v57, 7 }
0x127f   :  { %v4669_v40 = vsel %vm4668_vm8, %v4667_v29, %v4663_v24 }
0x1280   :  { %4672 = vst.msk [vmem:[%s6386_s9] sm:$0x3] %vm4671_vm9, %v4669_v40 }

</bundles_post_ra>
